<compile_context>
chip_gen: v6e
topology: v6e:2x2x1
jax: 0.10.0
libtpu: 0.0.40
codegen_flags: <defaults>
</compile_context>

<pallas_src>
import functools

import jax
import jax.numpy as jnp
from jax.experimental import pallas as pl
from jax.experimental.pallas import tpu as pltpu

FEAT = 741       # 3 * 13 * 19 (nn.Flatten output)
FEAT_PAD = 768   # 6 * 128 -> clean lane tiles on 128- and 256-wide MXUs
OUT_PAD = 128    # lane-dense output; column 0 holds the real logit


def _round_up(n, m):
    return ((n + m - 1) // m) * m


def _mlp_kernel(x_ref, w1_ref, b1_ref, w2_ref, b2_ref, w3_ref, b3_ref, o_ref):
    # Layer 1: Linear(768,768) + ReLU  (bf16 inputs, f32 accumulation, f32 bias)
    h1 = jnp.dot(x_ref[...], w1_ref[...], preferred_element_type=jnp.float32)
    h1 = jnp.maximum(h1 + b1_ref[...], 0.0)
    # Dropout(0.5) is identity in eval/inference mode.
    # TODO(synk): training-mode dropout would use pltpu.prng_seed + pltpu.stateful_bernoulli.

    # Layer 2: Linear(768,768) + ReLU
    h2 = jnp.dot(h1.astype(jnp.bfloat16), w2_ref[...],
                 preferred_element_type=jnp.float32)
    h2 = jnp.maximum(h2 + b2_ref[...], 0.0)
    # TODO(synk): optional int8 weight path for w1/w2 on v5e/v6e only (v7x MXU is fp8-only).

    # Layer 3: Linear(768,128-padded) + Sigmoid (only lane 0 is meaningful)
    logits = jnp.dot(h2.astype(jnp.bfloat16), w3_ref[...],
                     preferred_element_type=jnp.float32)
    logits = logits + b3_ref[...]
    # TODO(synk): on v5e at large batch, shrink writeback (bf16 out or lane-dense transpose).
    o_ref[...] = jax.nn.sigmoid(logits).astype(o_ref.dtype)


def prepare_params(params):
    """One-time prep: pad 741 -> 768/128 and cast weights to bf16 (biases stay f32).

    Call once and reuse the result for every forward call — this keeps the
    ~13 MB of padding/convert traffic out of the per-call path.

    Zero-padded input columns multiply zero weight rows, padded hidden lanes get
    zero bias and stay zero through ReLU, and padded w3 rows/cols are zero, so
    the real rows/column are bit-exact w.r.t. the unpadded computation.
    """
    w1, b1, w2, b2, w3, b3 = params

    def pad2(a, rows, cols):
        return jnp.pad(a, ((0, rows - a.shape[0]), (0, cols - a.shape[1])))

    w1p = pad2(w1.astype(jnp.float32), FEAT_PAD, FEAT_PAD).astype(jnp.bfloat16)
    w2p = pad2(w2.astype(jnp.float32), FEAT_PAD, FEAT_PAD).astype(jnp.bfloat16)
    w3p = pad2(w3.astype(jnp.float32), FEAT_PAD, OUT_PAD).astype(jnp.bfloat16)
    b1p = jnp.pad(b1.astype(jnp.float32).reshape(1, -1), ((0, 0), (0, FEAT_PAD - FEAT)))
    b2p = jnp.pad(b2.astype(jnp.float32).reshape(1, -1), ((0, 0), (0, FEAT_PAD - FEAT)))
    b3p = jnp.pad(b3.astype(jnp.float32).reshape(1, -1), ((0, 0), (0, OUT_PAD - 1)))
    return tuple(jax.device_put(p) for p in (w1p, b1p, w2p, b2p, w3p, b3p))


@functools.partial(jax.jit, donate_argnums=())
def neural_network_forward(x, padded_params):
    """x: any shape (B, ...) flattening to (B, 741). padded_params: prepare_params(...).

    Returns (B, 1) f32 sigmoid outputs.
    """
    w1p, b1p, w2p, b2p, w3p, b3p = padded_params
    B = x.shape[0]
    x_flat = x.reshape(B, -1)
    assert x_flat.shape[1] == FEAT, f"expected {FEAT} features, got {x_flat.shape[1]}"

    # Batch tiling: sublane-aligned; up to 512 rows per step. Guarantee >=2 grid
    # steps whenever B_pad > 256 so v7x megacore ("parallel" axis) has work for
    # both TensorCores; single-step grids are accepted for small batches.
    B8 = _round_up(B, 8)
    if B8 <= 256:
        TB = B8
    else:
        TB = min(512, _round_up(B8 // 2, 256))
    B_pad = _round_up(B8, TB)

    # Fused flatten + pad (B->B_pad, 741->768) + bf16 cast: one pad+convert op.
    xp = jnp.pad(x_flat.astype(jnp.float32),
                 ((0, B_pad - B), (0, FEAT_PAD - FEAT))).astype(jnp.bfloat16)

    # Weights/biases: constant index_map -> loaded once, resident across the
    # batch grid; Buffered(1) because they are never re-fetched (no need to
    # double-buffer, saves ~2.5 MiB VMEM).
    def resident(shape):
        return pl.BlockSpec(shape, lambda i: (0, 0), pipeline_mode=pl.Buffered(1))

    out = pl.pallas_call(
        _mlp_kernel,
        out_shape=jax.ShapeDtypeStruct((B_pad, OUT_PAD), jnp.float32),
        grid=(B_pad // TB,),
        in_specs=[
            pl.BlockSpec((TB, FEAT_PAD), lambda i: (i, 0)),   # x, tiled over batch
            resident((FEAT_PAD, FEAT_PAD)),                   # w1
            resident((1, FEAT_PAD)),                          # b1
            resident((FEAT_PAD, FEAT_PAD)),                   # w2
            resident((1, FEAT_PAD)),                          # b2
            resident((FEAT_PAD, OUT_PAD)),                    # w3
            resident((1, OUT_PAD)),                           # b3
        ],
        out_specs=pl.BlockSpec((TB, OUT_PAD), lambda i: (i, 0)),
        compiler_params=pltpu.CompilerParams(
            dimension_semantics=("parallel",),   # shards batch tiles across v7x's 2 TCs
            vmem_limit_bytes=32 << 20,           # safe on v7x (64 MiB) and below
        ),
    )(xp, w1p, b1p, w2p, b2p, w3p, b3p)

    # Drop batch padding and the 127 padded output lanes.
    return out[:B, :1]


def init_params(key):
    """Deterministic init mimicking nn.Linear (uniform in +/- 1/sqrt(fan_in))."""
    ks = jax.random.split(key, 6)
    bound = 1.0 / jnp.sqrt(FEAT)

    def uni(k, shape):
        return jax.random.uniform(k, shape, jnp.float32, -bound, bound)

    w1 = uni(ks[0], (FEAT, FEAT))   # stored as (in, out)
    b1 = uni(ks[1], (FEAT,))
    w2 = uni(ks[2], (FEAT, FEAT))
    b2 = uni(ks[3], (FEAT,))
    w3 = uni(ks[4], (FEAT, 1))
    b3 = uni(ks[5], (1,))
    return (w1, b1, w2, b2, w3, b3)


def _reference(x, params):
    w1, b1, w2, b2, w3, b3 = params
    xf = x.reshape(x.shape[0], -1).astype(jnp.float32)
    h1 = jnp.maximum(xf @ w1 + b1, 0.0)
    h2 = jnp.maximum(h1 @ w2 + b2, 0.0)
    return jax.nn.sigmoid(h2 @ w3 + b3)


if __name__ == "__main__":
    key = jax.random.PRNGKey(0)
    k_param, k_x = jax.random.split(key)
    params = init_params(k_param)

    # One-time weight prep (padding + bf16 cast) — outside the per-call path.
    padded_params = prepare_params(params)
    padded_params = jax.block_until_ready(padded_params)

    # (B, C, H, W) = (8, 3, 13, 19) so Flatten gives 741 features.
    x = jax.random.normal(k_x, (8, 3, 13, 19), dtype=jnp.float32)

    out = neural_network_forward(x, padded_params)
    out = jax.block_until_ready(out)

    ref = _reference(x, params)
    assert out.shape == (8, 1)
    # bf16 weights/activations vs f32 reference: loosened tolerance.
    assert jnp.allclose(out, ref, atol=2e-2, rtol=2e-2), "mismatch vs JAX reference"
    print("KERNEL_OK")
</pallas_src>

<mosaic_0001>
module attributes {stable_mosaic.version = 11 : i64} {
  func.func @_mlp_kernel(%arg0: i32, %arg1: memref<8x768xbf16, #tpu.memory_space<vmem>>, %arg2: memref<768x768xbf16, #tpu.memory_space<vmem>>, %arg3: memref<1x768xf32, #tpu.memory_space<vmem>>, %arg4: memref<768x768xbf16, #tpu.memory_space<vmem>>, %arg5: memref<1x768xf32, #tpu.memory_space<vmem>>, %arg6: memref<768x128xbf16, #tpu.memory_space<vmem>>, %arg7: memref<1x128xf32, #tpu.memory_space<vmem>>, %arg8: memref<8x128xf32, #tpu.memory_space<vmem>>) attributes {dimension_semantics = [#tpu.dimension_semantics<parallel>], iteration_bounds = array<i64: 1>, scalar_prefetch = 0 : i64, scratch_operands = 0 : i64, tpu.core_type = #tpu.core_type<tc>, window_params = [{transform_indices = @transform_0, window_bounds = array<i64: 8, 768>}, {pipeline_mode = #tpu.pipeline_mode<synchronous>, transform_indices = @transform_1, window_bounds = array<i64: 768, 768>}, {pipeline_mode = #tpu.pipeline_mode<synchronous>, transform_indices = @transform_2, window_bounds = array<i64: 1, 768>}, {pipeline_mode = #tpu.pipeline_mode<synchronous>, transform_indices = @transform_3, window_bounds = array<i64: 768, 768>}, {pipeline_mode = #tpu.pipeline_mode<synchronous>, transform_indices = @transform_4, window_bounds = array<i64: 1, 768>}, {pipeline_mode = #tpu.pipeline_mode<synchronous>, transform_indices = @transform_5, window_bounds = array<i64: 768, 128>}, {pipeline_mode = #tpu.pipeline_mode<synchronous>, transform_indices = @transform_6, window_bounds = array<i64: 1, 128>}, {transform_indices = @transform_7, window_bounds = array<i64: 8, 128>}]} {
    %c0 = arith.constant 0 : index
    %c0_0 = arith.constant 0 : index
    %0 = vector.load %arg1[%c0, %c0_0] : memref<8x768xbf16, #tpu.memory_space<vmem>>, vector<8x768xbf16>
    %c0_1 = arith.constant 0 : index
    %c0_2 = arith.constant 0 : index
    %1 = vector.load %arg2[%c0_1, %c0_2] : memref<768x768xbf16, #tpu.memory_space<vmem>>, vector<768x768xbf16>
    %cst = arith.constant dense<0.000000e+00> : vector<8x768xf32>
    %2 = tpu.matmul %0, %1, %cst {dimension_numbers = #tpu.dot_dimension_numbers<[1], [0], [0], [1], [0, 0, 1, 1], [], []>} : vector<8x768xbf16>, vector<768x768xbf16>, vector<8x768xf32> -> vector<8x768xf32>
    %c0_3 = arith.constant 0 : index
    %c0_4 = arith.constant 0 : index
    %3 = vector.load %arg3[%c0_3, %c0_4] : memref<1x768xf32, #tpu.memory_space<vmem>>, vector<1x768xf32>
    %4 = vector.broadcast %3 : vector<1x768xf32> to vector<8x768xf32>
    %5 = arith.addf %2, %4 : vector<8x768xf32>
    %cst_5 = arith.constant 0.000000e+00 : f32
    %6 = vector.broadcast %cst_5 : f32 to vector<8x768xf32>
    %7 = arith.maximumf %5, %6 : vector<8x768xf32>
    %8 = arith.truncf %7 : vector<8x768xf32> to vector<8x768xbf16>
    %c0_6 = arith.constant 0 : index
    %c0_7 = arith.constant 0 : index
    %9 = vector.load %arg4[%c0_6, %c0_7] : memref<768x768xbf16, #tpu.memory_space<vmem>>, vector<768x768xbf16>
    %cst_8 = arith.constant dense<0.000000e+00> : vector<8x768xf32>
    %10 = tpu.matmul %8, %9, %cst_8 {dimension_numbers = #tpu.dot_dimension_numbers<[1], [0], [0], [1], [0, 0, 1, 1], [], []>} : vector<8x768xbf16>, vector<768x768xbf16>, vector<8x768xf32> -> vector<8x768xf32>
    %c0_9 = arith.constant 0 : index
    %c0_10 = arith.constant 0 : index
    %11 = vector.load %arg5[%c0_9, %c0_10] : memref<1x768xf32, #tpu.memory_space<vmem>>, vector<1x768xf32>
    %12 = vector.broadcast %11 : vector<1x768xf32> to vector<8x768xf32>
    %13 = arith.addf %10, %12 : vector<8x768xf32>
    %cst_11 = arith.constant 0.000000e+00 : f32
    %14 = vector.broadcast %cst_11 : f32 to vector<8x768xf32>
    %15 = arith.maximumf %13, %14 : vector<8x768xf32>
    %16 = arith.truncf %15 : vector<8x768xf32> to vector<8x768xbf16>
    %c0_12 = arith.constant 0 : index
    %c0_13 = arith.constant 0 : index
    %17 = vector.load %arg6[%c0_12, %c0_13] : memref<768x128xbf16, #tpu.memory_space<vmem>>, vector<768x128xbf16>
    %cst_14 = arith.constant dense<0.000000e+00> : vector<8x128xf32>
    %18 = tpu.matmul %16, %17, %cst_14 {dimension_numbers = #tpu.dot_dimension_numbers<[1], [0], [0], [1], [0, 0, 1, 1], [], []>} : vector<8x768xbf16>, vector<768x128xbf16>, vector<8x128xf32> -> vector<8x128xf32>
    %c0_15 = arith.constant 0 : index
    %c0_16 = arith.constant 0 : index
    %19 = vector.load %arg7[%c0_15, %c0_16] : memref<1x128xf32, #tpu.memory_space<vmem>>, vector<1x128xf32>
    %20 = vector.broadcast %19 : vector<1x128xf32> to vector<8x128xf32>
    %21 = arith.addf %18, %20 : vector<8x128xf32>
    %22 = arith.negf %21 : vector<8x128xf32>
    %23 = math.exp %22 : vector<8x128xf32>
    %cst_17 = arith.constant 1.000000e+00 : f32
    %24 = vector.broadcast %cst_17 : f32 to vector<8x128xf32>
    %25 = arith.addf %24, %23 : vector<8x128xf32>
    %26 = arith.divf %24, %25 : vector<8x128xf32>
    %c0_18 = arith.constant 0 : index
    %c0_19 = arith.constant 0 : index
    %27 = vector.load %arg8[%c0_18, %c0_19] : memref<8x128xf32, #tpu.memory_space<vmem>>, vector<8x128xf32>
    tpu.vector_store %arg8[%c0_18, %c0_19], %26 {strides = array<i32>} : memref<8x128xf32, #tpu.memory_space<vmem>>, vector<8x128xf32>,
    return
  }
  func.func @transform_0(%arg0: i32) -> (i32, i32) {
    %c0_i32 = arith.constant 0 : i32
    %c0_i32_0 = arith.constant 0 : i32
    return %arg0, %c0_i32 : i32, i32
  }
  func.func @transform_1(%arg0: i32) -> (i32, i32) {
    %c0_i32 = arith.constant 0 : i32
    %c0_i32_0 = arith.constant 0 : i32
    %c0_i32_1 = arith.constant 0 : i32
    return %c0_i32, %c0_i32_0 : i32, i32
  }
  func.func @transform_2(%arg0: i32) -> (i32, i32) {
    %c0_i32 = arith.constant 0 : i32
    %c0_i32_0 = arith.constant 0 : i32
    %c0_i32_1 = arith.constant 0 : i32
    return %c0_i32, %c0_i32_0 : i32, i32
  }
  func.func @transform_3(%arg0: i32) -> (i32, i32) {
    %c0_i32 = arith.constant 0 : i32
    %c0_i32_0 = arith.constant 0 : i32
    %c0_i32_1 = arith.constant 0 : i32
    return %c0_i32, %c0_i32_0 : i32, i32
  }
  func.func @transform_4(%arg0: i32) -> (i32, i32) {
    %c0_i32 = arith.constant 0 : i32
    %c0_i32_0 = arith.constant 0 : i32
    %c0_i32_1 = arith.constant 0 : i32
    return %c0_i32, %c0_i32_0 : i32, i32
  }
  func.func @transform_5(%arg0: i32) -> (i32, i32) {
    %c0_i32 = arith.constant 0 : i32
    %c0_i32_0 = arith.constant 0 : i32
    %c0_i32_1 = arith.constant 0 : i32
    return %c0_i32, %c0_i32_0 : i32, i32
  }
  func.func @transform_6(%arg0: i32) -> (i32, i32) {
    %c0_i32 = arith.constant 0 : i32
    %c0_i32_0 = arith.constant 0 : i32
    %c0_i32_1 = arith.constant 0 : i32
    return %c0_i32, %c0_i32_0 : i32, i32
  }
  func.func @transform_7(%arg0: i32) -> (i32, i32) {
    %c0_i32 = arith.constant 0 : i32
    %c0_i32_0 = arith.constant 0 : i32
    return %arg0, %c0_i32 : i32, i32
  }
}

</mosaic_0001>

<bundles_post_ra>
// kernel: neural_network_forward.1
= control target key start
LH: loop header
LB: loop body
LE: loop exit
PB: predicated region body
PF: predicated region fallthrough
CT: control target
= control target key end

     0   :  { %12 = vsyncpa [#allocation3], 0  ;;  %s6941_s0 = inlined_call_operand.vmem [shape: bf16[8,768], index: 0, kind: input, shape index: {}]   ;;  %s6942_s1 = inlined_call_operand.hbm [shape: bf16[768,768], index: 1, kind: input, shape index: {}]   ;;  %s6943_s2 = inlined_call_operand.hbm [shape: f32[1,768], index: 2, kind: input, shape index: {}]   ;;  %s6944_s3 = inlined_call_operand.hbm [shape: bf16[768,768], index: 3, kind: input, shape index: {}]   ;;  %s6945_s4 = inlined_call_operand.hbm [shape: f32[1,768], index: 4, kind: input, shape index: {}]   ;;  %s6946_s5 = inlined_call_operand.hbm [shape: bf16[768,128], index: 5, kind: input, shape index: {}]   ;;  %s6947_s6 = inlined_call_operand.hbm [shape: f32[1,128], index: 6, kind: input, shape index: {}]   ;;  %s6948_s7 = inlined_call_operand.vmem [shape: f32[8,128], index: 7, kind: output, shape index: {}]  }
   0x1   :  { %13 = vsyncpa [#allocation5], 0 }
   0x2   :  { %14 = vsyncpa [#allocation8], 0 }
   0x3   :  { %15 = vsyncpa [#allocation11], 0  ;;  %s6693_s24 = smov [#allocation4]   ;;  %s6694_s26 = smov [#allocation7]  }
   0x4   :  { %s36_s25 = sshll.u32 %s6693_s24, 4  ;;  %s58_s27 = sshll.u32 %s6694_s26, 4  ;;  %s37_s25 = int_to_ptr.vmem [resolvable:$true] %s36_s25  ;;  %s59_s27 = int_to_ptr.vmem [resolvable:$true] %s58_s27 }
   0x5   :  { %s6573_s28 = scalar_lea.vmem %s37_s25, 96  ;;  %p6578_p1 = scmp.lt.s32.totalorder %s37_s25, %s37_s25 }
   0x6   :  { %p6574_p0 = scmp.ne.s32.totalorder %s37_s25, %s6573_s28  ;;  %p6579_p2 = scmp.lt.s32.totalorder %s6573_s28, %s6573_s28 }
   0x8   :  { %p6580_p3 = por %p6579_p2, %p6578_p1 }
   0xa   :  { %p6581_p4 = pnand %p6580_p3, %p6574_p0 }
   0xc   :  { %6584 = shalt.err (!%p6581_p4)
}
   0xd   :  { %39 = dma.hbm_to_vmem [thread:$0]  %s6943_s2, 96, %s37_s25, [#allocation5]  }
   0xe   :  { %s6593_s8 = scalar_lea.vmem %s59_s27, 96  ;;  %p6598_p6 = scmp.lt.s32.totalorder %s59_s27, %s59_s27 }
   0xf   :  { %p6594_p5 = scmp.ne.s32.totalorder %s59_s27, %s6593_s8  ;;  %p6599_p7 = scmp.lt.s32.totalorder %s6593_s8, %s6593_s8 }
  0x11   :  { %p6600_p8 = por %p6599_p7, %p6598_p6 }
  0x13   :  { %p6601_p9 = pnand %p6600_p8, %p6594_p5 }
  0x15   :  { %6604 = shalt.err (!%p6601_p9)
}
  0x16   :  { %61 = dma.hbm_to_vmem [thread:$0]  %s6945_s4, 96, %s59_s27, [#allocation8]  }
  0x17   :  { %s6695_s11 = smov [#allocation2]  }
  0x18   :  { %s23_s12 = sshll.u32 %s6695_s11, 4  ;;  %s24_s12 = int_to_ptr.vmem [resolvable:$true] %s23_s12 }
  0x19   :  { %s6613_s13 = scalar_lea.vmem %s24_s12, 36864  ;;  %p6618_p11 = scmp.lt.s32.totalorder %s24_s12, %s24_s12 }
  0x1a   :  { %p6614_p10 = scmp.ne.s32.totalorder %s24_s12, %s6613_s13  ;;  %p6619_p12 = scmp.lt.s32.totalorder %s6613_s13, %s6613_s13 }
  0x1c   :  { %p6620_p13 = por %p6619_p12, %p6618_p11 }
  0x1e   :  { %p6621_p0 = pnand %p6620_p13, %p6614_p10 }
  0x20   :  { %6624 = shalt.err (!%p6621_p0)
}
  0x21   :  { %s6696_s2 = smov 384   ;;  %s6697_s14 = smov 24  }
  0x22   :  { %29 = dma.hbm_to_vmem [thread:$0]  %s6942_s1, 36864, %s24_s12, [#allocation3], %s6696_s2, %s6696_s2, %s6697_s14  }
  0x23   :  { %s6698_s17 = smov [#allocation6]   ;;  %s6699_s4 = smov [#allocation9]  }
  0x24   :  { %s45_s18 = sshll.u32 %s6698_s17, 4  ;;  %s67_s19 = sshll.u32 %s6699_s4, 4  ;;  %s46_s18 = int_to_ptr.vmem [resolvable:$true] %s45_s18  ;;  %s68_s19 = int_to_ptr.vmem [resolvable:$true] %s67_s19 }
  0x25   :  { %s6633_s20 = scalar_lea.vmem %s46_s18, 36864  ;;  %p6638_p2 = scmp.lt.s32.totalorder %s46_s18, %s46_s18 }
  0x26   :  { %p6634_p1 = scmp.ne.s32.totalorder %s46_s18, %s6633_s20  ;;  %p6639_p3 = scmp.lt.s32.totalorder %s6633_s20, %s6633_s20 }
  0x28   :  { %p6640_p4 = por %p6639_p3, %p6638_p2 }
  0x2a   :  { %p6641_p5 = pnand %p6640_p4, %p6634_p1 }
  0x2c   :  { %6644 = shalt.err (!%p6641_p5)
}
  0x2d   :  { %51 = dma.hbm_to_vmem [thread:$0]  %s6944_s3, 36864, %s46_s18, [#allocation5], %s6696_s2, %s6696_s2, %s6697_s14  }
  0x2e   :  { %s6653_s23 = scalar_lea.vmem %s68_s19, 6144  ;;  %p6658_p7 = scmp.lt.s32.totalorder %s68_s19, %s68_s19 }
  0x2f   :  { %p6654_p6 = scmp.ne.s32.totalorder %s68_s19, %s6653_s23  ;;  %p6659_p8 = scmp.lt.s32.totalorder %s6653_s23, %s6653_s23 }
  0x31   :  { %p6660_p9 = por %p6659_p8, %p6658_p7 }
  0x33   :  { %p6661_p10 = pnand %p6660_p9, %p6654_p6 }
  0x35   :  { %6664 = shalt.err (!%p6661_p10)
}
  0x36   :  { %s6700_s1 = smov 64   ;;  %s6701_s24 = smov 4  }
  0x37   :  { %73 = dma.hbm_to_vmem [thread:$0]  %s6946_s5, 6144, %s68_s19, [#allocation8], %s6700_s1, %s6700_s1, %s6701_s24  }
  0x38   :  { %s6702_s27 = smov [#allocation10]  }
  0x39   :  { %s80_s28 = sshll.u32 %s6702_s27, 4  ;;  %s81_s28 = int_to_ptr.vmem [resolvable:$true] %s80_s28 }
  0x3a   :  { %s6673_s29 = scalar_lea.vmem %s81_s28, 16  ;;  %s6677_s3 = scalar_lea.vmem %s81_s28, 32 }
  0x3b   :  { %p6674_p11 = scmp.ne.s32.totalorder %s81_s28, %s6673_s29  ;;  %p6678_p12 = scmp.lt.s32.totalorder %s81_s28, %s81_s28 }
  0x3c   :  { %p6679_p13 = scmp.lt.s32.totalorder %s6677_s3, %s6673_s29 }
  0x3e   :  { %p6680_p0 = por %p6679_p13, %p6678_p12 }
  0x40   :  { %p6681_p1 = pnand %p6680_p0, %p6674_p11 }
  0x42   :  { %6684 = shalt.err (!%p6681_p1)
}
  0x43   :  { %83 = dma.hbm_to_vmem [thread:$0]  %s6947_s6, 16, %s81_s28, [#allocation11]  }
  0x44   :  { %6685 = dma.done.wait [#allocation3], 36864  }
  0x45   :  { %6686 = vsyncadd [#allocation3], 4294930432 }
  0x46   :  { %6687 = dma.done.wait [#allocation5], 36960  }
  0x47   :  { %6688 = vsyncadd [#allocation5], 4294930336 }
  0x48   :  { %6689 = dma.done.wait [#allocation8], 6240  }
  0x49   :  { %6690 = vsyncadd [#allocation8], 4294961056 }
  0x4a   :  { %6691 = dma.done.wait [#allocation11], 16  }
  0x4b   :  { %6692 = vsyncadd [#allocation11], 4294967280  ;;  %v5643_v0 = vld [vmem:[#allocation2 + $0x154] ss:$24 sps:$4 sm:$0xff]   ;;  %v5645_v1 = vld [vmem:[#allocation2 + $0x150] ss:$24 sps:$4 sm:$0xff]  }
  0x4c   :  { %1887 = vmatprep.subr.bf16.mxu0 %v5643_v0  ;;  %v5646_v2 = vld [vmem:[#allocation2 + $0x454] ss:$24 sps:$4 sm:$0xff]   ;;  %v5648_v3 = vld [vmem:[#allocation2 + $0x450] ss:$24 sps:$4 sm:$0xff]   ;;  %v5649_v4 = vld [vmem:[#allocation2 + $0x124] ss:$24 sps:$4 sm:$0xff]  }
  0x4d   :  { %1888 = vmatpush1.bf16.msra.mxu0 %v5645_v1  ;;  %v5651_v5 = vld [vmem:[#allocation2 + $0x120] ss:$24 sps:$4 sm:$0xff]   ;;  %1928 = vmatprep.subr.bf16.mxu1 %v5646_v2  ;;  %v5652_v6 = vld [vmem:[#allocation2 + $0x424] ss:$24 sps:$4 sm:$0xff]   ;;  %v5655_v8 = vld [vmem:[#allocation2 + $0xf4] ss:$24 sps:$4 sm:$0xff]  }
  0x4e   :  { %1929 = vmatpush1.bf16.msra.mxu1 %v5648_v3  ;;  %1889 = vmatprep.subr.bf16.mxu0 %v5649_v4  ;;  %v5654_v7 = vld [vmem:[#allocation2 + $0x420] ss:$24 sps:$4 sm:$0xff]   ;;  %v5657_v9 = vld [vmem:[#allocation2 + $0xf0] ss:$24 sps:$4 sm:$0xff]   ;;  %v5658_v10 = vld [vmem:[#allocation2 + $0x3f4] ss:$24 sps:$4 sm:$0xff]  }
  0x4f   :  { %1930 = vmatprep.subr.bf16.mxu1 %v5652_v6  ;;  %v5661_v11 = vld [vmem:[#allocation2 + $0xc4] ss:$24 sps:$4 sm:$0xff]   ;;  %v5660_v12 = vld [vmem:[#allocation2 + $0x3f0] ss:$24 sps:$4 sm:$0xff]   ;;  %v5663_v14 = vld [vmem:[#allocation2 + $0xc0] ss:$24 sps:$4 sm:$0xff]  }
  0x50   :  { %v5664_v13 = vld [vmem:[#allocation2 + $0x3c4] ss:$24 sps:$4 sm:$0xff]   ;;  %v5667_v15 = vld [vmem:[#allocation2 + $0x94] ss:$24 sps:$4 sm:$0xff]   ;;  %v5666_v16 = vld [vmem:[#allocation2 + $0x3c0] ss:$24 sps:$4 sm:$0xff]  }
  0x51   :  { %1890 = vmatpush1.bf16.msra.mxu0 %v5651_v5  ;;  %v5670_v17 = vld [vmem:[#allocation2 + $0x394] ss:$24 sps:$4 sm:$0xff]   ;;  %v5669_v18 = vld [vmem:[#allocation2 + $0x90] ss:$24 sps:$4 sm:$0xff]   ;;  %v5673_v19 = vld [vmem:[#allocation2 + $0x64] ss:$24 sps:$4 sm:$0xff]  }
  0x52   :  { %1891 = vmatprep.subr.bf16.mxu0 %v5655_v8  ;;  %1931 = vmatpush1.bf16.msra.mxu1 %v5654_v7  ;;  %v5672_v20 = vld [vmem:[#allocation2 + $0x390] ss:$24 sps:$4 sm:$0xff]   ;;  %v5676_v21 = vld [vmem:[#allocation2 + $0x364] ss:$24 sps:$4 sm:$0xff]   ;;  %v5675_v22 = vld [vmem:[#allocation2 + $0x60] ss:$24 sps:$4 sm:$0xff]  }
  0x53   :  { %1932 = vmatprep.subr.bf16.mxu1 %v5658_v10  ;;  %v5679_v23 = vld [vmem:[#allocation2 + $0x34] ss:$24 sps:$4 sm:$0xff]   ;;  %v5678_v24 = vld [vmem:[#allocation2 + $0x360] ss:$24 sps:$4 sm:$0xff]   ;;  %v5681_v26 = vld [vmem:[#allocation2 + $0x30] ss:$24 sps:$4 sm:$0xff]  }
  0x54   :  { %v5682_v25 = vld [vmem:[#allocation2 + $0x334] ss:$24 sps:$4 sm:$0xff]   ;;  %v5685_v27 = vld [vmem:[#allocation2 + $0x4] ss:$24 sps:$4 sm:$0xff]   ;;  %v5684_v28 = vld [vmem:[#allocation2 + $0x330] ss:$24 sps:$4 sm:$0xff]  }
  0x55   :  { %1892 = vmatpush1.bf16.msra.mxu0 %v5657_v9  ;;  %v5688_v29 = vld [vmem:[#allocation2 + $0x304] ss:$24 sps:$4 sm:$0xff]   ;;  %v5687_v30 = vld [vmem:[#allocation2] ss:$24 sps:$4 sm:$0xff]   ;;  %v5691_v31 = vld [vmem:[#allocation2 + $0x2d4] ss:$24 sps:$4 sm:$0xff]  }
  0x56   :  { %1893 = vmatprep.subr.bf16.mxu0 %v5661_v11  ;;  %1933 = vmatpush1.bf16.msra.mxu1 %v5660_v12  ;;  %v5690_v32 = vld [vmem:[#allocation2 + $0x300] ss:$24 sps:$4 sm:$0xff]   ;;  %v5694_v33 = vld [vmem:[#allocation2 + $0x5d4] ss:$24 sps:$4 sm:$0xff]   ;;  %v5693_v34 = vld [vmem:[#allocation2 + $0x2d0] ss:$24 sps:$4 sm:$0xff]  }
  0x57   :  { %1934 = vmatprep.subr.bf16.mxu1 %v5664_v13  ;;  %v5697_v35 = vld [vmem:[#allocation2 + $0x2a4] ss:$24 sps:$4 sm:$0xff]   ;;  %v5696_v36 = vld [vmem:[#allocation2 + $0x5d0] ss:$24 sps:$4 sm:$0xff]   ;;  %v5699_v38 = vld [vmem:[#allocation2 + $0x2a0] ss:$24 sps:$4 sm:$0xff]  }
  0x58   :  { %v5700_v37 = vld [vmem:[#allocation2 + $0x5a4] ss:$24 sps:$4 sm:$0xff]   ;;  %v5703_v39 = vld [vmem:[#allocation2 + $0x274] ss:$24 sps:$4 sm:$0xff]   ;;  %v5702_v40 = vld [vmem:[#allocation2 + $0x5a0] ss:$24 sps:$4 sm:$0xff]  }
  0x59   :  { %1894 = vmatpush1.bf16.msra.mxu0 %v5663_v14  ;;  %v5706_v41 = vld [vmem:[#allocation2 + $0x574] ss:$24 sps:$4 sm:$0xff]   ;;  %v5705_v42 = vld [vmem:[#allocation2 + $0x270] ss:$24 sps:$4 sm:$0xff]   ;;  %v5709_v43 = vld [vmem:[#allocation2 + $0x244] ss:$24 sps:$4 sm:$0xff]  }
  0x5a   :  { %1895 = vmatprep.subr.bf16.mxu0 %v5667_v15  ;;  %1935 = vmatpush1.bf16.msra.mxu1 %v5666_v16  ;;  %v5708_v44 = vld [vmem:[#allocation2 + $0x570] ss:$24 sps:$4 sm:$0xff]   ;;  %v5712_v45 = vld [vmem:[#allocation2 + $0x544] ss:$24 sps:$4 sm:$0xff]   ;;  %v5711_v47 = vld [vmem:[#allocation2 + $0x240] ss:$24 sps:$4 sm:$0xff]  }
  0x5b   :  { %1936 = vmatprep.subr.bf16.mxu1 %v5670_v17  ;;  %v103_v46 = vld [vmem:[%s6941_s0] sm:$0xff]  ;;  %v5715_v49 = vld [vmem:[#allocation2 + $0x214] ss:$24 sps:$4 sm:$0xff]   ;;  %v5717_v54 = vld [vmem:[#allocation2 + $0x210] ss:$24 sps:$4 sm:$0xff]  }
  0x5c   :  { %v6764_v48 = vcombine.high %v103_v46, %v103_v46  ;;  %v104_v50 = vld [vmem:[%s6941_s0 + $0x8] sm:$0xff]  ;;  %v5714_v51 = vld [vmem:[#allocation2 + $0x540] ss:$24 sps:$4 sm:$0xff]   ;;  %v5721_v55 = vld [vmem:[#allocation2 + $0x1e4] ss:$24 sps:$4 sm:$0xff]   ;;  %v6773_v5 = vcombine.low %v103_v46, %v103_v46 }
  0x5d   :  { %1896 = vmatpush1.bf16.msra.mxu0 %v5669_v18  ;;  %v6770_v52 = vcombine.high %v104_v50, %v104_v50  ;;  %v5718_v53 = vld [vmem:[#allocation2 + $0x514] ss:$24 sps:$4 sm:$0xff]   ;;  %v5720_v56 = vld [vmem:[#allocation2 + $0x510] ss:$24 sps:$4 sm:$0xff]   ;;  %v5724_v57 = vld [vmem:[#allocation2 + $0x4e4] ss:$24 sps:$4 sm:$0xff]   ;;  %v6775_v8 = vcombine.low %v104_v50, %v104_v50 }
  0x5e   :  { %1897 = vmatprep.subr.bf16.mxu0 %v5673_v19  ;;  %1937 = vmatpush1.bf16.msra.mxu1 %v5672_v20  ;;  %v5723_v58 = vld [vmem:[#allocation2 + $0x1e0] ss:$24 sps:$4 sm:$0xff]   ;;  %v5727_v59 = vld [vmem:[#allocation2 + $0x1b4] ss:$24 sps:$4 sm:$0xff]   ;;  %v5729_v62 = vld [vmem:[#allocation2 + $0x1b0] ss:$24 sps:$4 sm:$0xff]  }
  0x5f   :  { %1938 = vmatprep.subr.bf16.mxu1 %v5676_v21  ;;  %1919 = vmatprep.mubr.bf16.mxu0 %v6764_v48  ;;  %v5726_v60 = vld [vmem:[#allocation2 + $0x4e0] ss:$24 sps:$4 sm:$0xff]   ;;  %v5730_v61 = vld [vmem:[#allocation2 + $0x4b4] ss:$24 sps:$4 sm:$0xff]   ;;  %v5733_v63 = vld [vmem:[#allocation2 + $0x184] ss:$24 sps:$4 sm:$0xff]  }
  0x60   :  { %1960 = vmatprep.mubr.bf16.mxu1 %v6770_v52  ;;  %v5732_v0 = vld [vmem:[#allocation2 + $0x4b0] ss:$24 sps:$4 sm:$0xff]   ;;  %v5736_v1 = vld [vmem:[#allocation2 + $0x484] ss:$24 sps:$4 sm:$0xff]   ;;  %v5735_v2 = vld [vmem:[#allocation2 + $0x180] ss:$24 sps:$4 sm:$0xff]  }
  0x61   :  { %1898 = vmatpush1.bf16.msra.mxu0 %v5675_v22  ;;  %v5743_v3 = vld [vmem:[#allocation2 + $0x754] ss:$24 sps:$4 sm:$0xff]   ;;  %v5739_v4 = vld [vmem:[#allocation2 + $0x480] ss:$24 sps:$4 sm:$0xff]   ;;  %v5741_v7 = vld [vmem:[#allocation2 + $0x750] ss:$24 sps:$4 sm:$0xff]  }
  0x62   :  { %1899 = vmatprep.subr.bf16.mxu0 %v5679_v23  ;;  %1939 = vmatpush1.bf16.msra.mxu1 %v5678_v24  ;;  %v5748_v6 = vld [vmem:[#allocation2 + $0x15c] ss:$24 sps:$4 sm:$0xff]   ;;  %v5746_v10 = vld [vmem:[#allocation2 + $0x158] ss:$24 sps:$4 sm:$0xff]   ;;  %v5754_v11 = vld [vmem:[#allocation2 + $0x12c] ss:$24 sps:$4 sm:$0xff]  }
  0x63   :  { %1940 = vmatprep.subr.bf16.mxu1 %v5682_v25  ;;  %v5751_v9 = vld [vmem:[#allocation2 + $0x724] ss:$24 sps:$4 sm:$0xff]   ;;  %v5749_v12 = vld [vmem:[#allocation2 + $0x720] ss:$24 sps:$4 sm:$0xff]   ;;  %v5757_v13 = vld [vmem:[#allocation2 + $0x6f4] ss:$24 sps:$4 sm:$0xff]  }
  0x64   :  { %v5752_v14 = vld [vmem:[#allocation2 + $0x128] ss:$24 sps:$4 sm:$0xff]   ;;  %v5760_v15 = vld [vmem:[#allocation2 + $0xfc] ss:$24 sps:$4 sm:$0xff]   ;;  %v5758_v18 = vld [vmem:[#allocation2 + $0xf8] ss:$24 sps:$4 sm:$0xff]  }
  0x65   :  { %1900 = vmatpush1.bf16.msra.mxu0 %v5681_v26  ;;  %v5755_v16 = vld [vmem:[#allocation2 + $0x6f0] ss:$24 sps:$4 sm:$0xff]   ;;  %v5763_v17 = vld [vmem:[#allocation2 + $0x6c4] ss:$24 sps:$4 sm:$0xff]   ;;  %v5761_v20 = vld [vmem:[#allocation2 + $0x6c0] ss:$24 sps:$4 sm:$0xff]  }
  0x66   :  { %1901 = vmatprep.subr.bf16.mxu0 %v5685_v27  ;;  %1941 = vmatpush1.bf16.msra.mxu1 %v5684_v28  ;;  %v5766_v19 = vld [vmem:[#allocation2 + $0xcc] ss:$24 sps:$4 sm:$0xff]   ;;  %v5764_v22 = vld [vmem:[#allocation2 + $0xc8] ss:$24 sps:$4 sm:$0xff]   ;;  %v5772_v23 = vld [vmem:[#allocation2 + $0x9c] ss:$24 sps:$4 sm:$0xff]  }
  0x67   :  { %1942 = vmatprep.subr.bf16.mxu1 %v5688_v29  ;;  %v5769_v21 = vld [vmem:[#allocation2 + $0x694] ss:$24 sps:$4 sm:$0xff]   ;;  %v5767_v24 = vld [vmem:[#allocation2 + $0x690] ss:$24 sps:$4 sm:$0xff]   ;;  %v5775_v25 = vld [vmem:[#allocation2 + $0x664] ss:$24 sps:$4 sm:$0xff]  }
  0x68   :  { %v5770_v26 = vld [vmem:[#allocation2 + $0x98] ss:$24 sps:$4 sm:$0xff]   ;;  %v5778_v27 = vld [vmem:[#allocation2 + $0x6c] ss:$24 sps:$4 sm:$0xff]   ;;  %v5808_v50 = vld [vmem:[#allocation2 + $0x27c] ss:$24 sps:$4 sm:$0xff]  }
  0x69   :  { %1902 = vmatpush1.bf16.msra.mxu0 %v5687_v30  ;;  %v5773_v28 = vld [vmem:[#allocation2 + $0x660] ss:$24 sps:$4 sm:$0xff]   ;;  %v5781_v29 = vld [vmem:[#allocation2 + $0x634] ss:$24 sps:$4 sm:$0xff]  }
  0x6a   :  { %1903 = vmatprep.subr.bf16.mxu0 %v5691_v31  ;;  %1943 = vmatpush1.bf16.msra.mxu1 %v5690_v32  ;;  %v5776_v30 = vld [vmem:[#allocation2 + $0x68] ss:$24 sps:$4 sm:$0xff]   ;;  %v5784_v31 = vld [vmem:[#allocation2 + $0x3c] ss:$24 sps:$4 sm:$0xff]  }
  0x6b   :  { %1944 = vmatprep.subr.bf16.mxu1 %v5694_v33  ;;  %v6783_v32 = vld [vmem:[%s6941_s0 + $0x10] sm:$0xff]  ;;  %v5797_v46 = vld [vmem:[#allocation2 + $0x8a0] ss:$24 sps:$4 sm:$0xff]  }
  0x6c   :  { %v5779_v33 = vld [vmem:[#allocation2 + $0x630] ss:$24 sps:$4 sm:$0xff]  }
  0x6d   :  { %1904 = vmatpush2.bf16.msra.mxu0 %v5693_v34  ;;  %v6787_v34 = vcombine.high %v6783_v32, %v6783_v32 }
  0x6e   :  { %1905 = vmatprep.subr.bf16.mxu0 %v5697_v35  ;;  %1945 = vmatpush2.bf16.msra.mxu1 %v5696_v36  ;;  %v5787_v35 = vld [vmem:[#allocation2 + $0x604] ss:$24 sps:$4 sm:$0xff]   ;;  %v5782_v36 = vld [vmem:[#allocation2 + $0x38] ss:$24 sps:$4 sm:$0xff]  }
  0x6f   :  { %1946 = vmatprep.subr.bf16.mxu1 %v5700_v37  ;;  %v5790_v37 = vld [vmem:[#allocation2 + $0xc] ss:$24 sps:$4 sm:$0xff]  }
  0x71   :  { %1906 = vmatpush2.bf16.msra.mxu0 %v5699_v38  ;;  %v5785_v38 = vld [vmem:[#allocation2 + $0x600] ss:$24 sps:$4 sm:$0xff]  }
  0x72   :  { %1907 = vmatprep.subr.bf16.mxu0 %v5703_v39  ;;  %1947 = vmatpush2.bf16.msra.mxu1 %v5702_v40  ;;  %v5793_v39 = vld [vmem:[#allocation2 + $0x8d4] ss:$24 sps:$4 sm:$0xff]   ;;  %v5788_v40 = vld [vmem:[#allocation2 + $0x8] ss:$24 sps:$4 sm:$0xff]  }
  0x73   :  { %1948 = vmatprep.subr.bf16.mxu1 %v5706_v41  ;;  %v5796_v41 = vld [vmem:[#allocation2 + $0x2dc] ss:$24 sps:$4 sm:$0xff]  }
  0x75   :  { %1908 = vmatpush2.bf16.msra.mxu0 %v5705_v42  ;;  %v5791_v42 = vld [vmem:[#allocation2 + $0x8d0] ss:$24 sps:$4 sm:$0xff]  }
  0x76   :  { %1909 = vmatprep.subr.bf16.mxu0 %v5709_v43  ;;  %1949 = vmatpush2.bf16.msra.mxu1 %v5708_v44  ;;  %v5799_v43 = vld [vmem:[#allocation2 + $0x8a4] ss:$24 sps:$4 sm:$0xff]   ;;  %v5794_v44 = vld [vmem:[#allocation2 + $0x2d8] ss:$24 sps:$4 sm:$0xff]  }
  0x77   :  { %1950 = vmatprep.subr.bf16.mxu1 %v5712_v45  ;;  %v5802_v45 = vld [vmem:[#allocation2 + $0x2ac] ss:$24 sps:$4 sm:$0xff]  }
  0x79   :  { %1910 = vmatpush2.bf16.msra.mxu0 %v5711_v47  ;;  %v5805_v47 = vld [vmem:[#allocation2 + $0x874] ss:$24 sps:$4 sm:$0xff]  }
  0x7a   :  { %1911 = vmatprep.subr.bf16.mxu0 %v5715_v49  ;;  %1951 = vmatpush2.bf16.msra.mxu1 %v5714_v51  ;;  %v5800_v49 = vld [vmem:[#allocation2 + $0x2a8] ss:$24 sps:$4 sm:$0xff]  }
  0x7b   :  { %1952 = vmatprep.subr.bf16.mxu1 %v5718_v53  ;;  %v5803_v51 = vld [vmem:[#allocation2 + $0x870] ss:$24 sps:$4 sm:$0xff]   ;;  %v5811_v53 = vld [vmem:[#allocation2 + $0x844] ss:$24 sps:$4 sm:$0xff]  }
  0x7d   :  { %1912 = vmatpush2.bf16.msra.mxu0 %v5717_v54  ;;  %v5806_v54 = vld [vmem:[#allocation2 + $0x278] ss:$24 sps:$4 sm:$0xff]  }
  0x7e   :  { %1913 = vmatprep.subr.bf16.mxu0 %v5721_v55  ;;  %1953 = vmatpush2.bf16.msra.mxu1 %v5720_v56  ;;  %v5814_v55 = vld [vmem:[#allocation2 + $0x24c] ss:$24 sps:$4 sm:$0xff]   ;;  %v5809_v56 = vld [vmem:[#allocation2 + $0x840] ss:$24 sps:$4 sm:$0xff]  }
  0x7f   :  { %1954 = vmatprep.subr.bf16.mxu1 %v5724_v57  ;;  %v5817_v57 = vld [vmem:[#allocation2 + $0x814] ss:$24 sps:$4 sm:$0xff]  }
  0x81   :  { %1914 = vmatpush2.bf16.msra.mxu0 %v5723_v58  ;;  %v5812_v58 = vld [vmem:[#allocation2 + $0x248] ss:$24 sps:$4 sm:$0xff]  }
  0x82   :  { %1915 = vmatprep.subr.bf16.mxu0 %v5727_v59  ;;  %1955 = vmatpush2.bf16.msra.mxu1 %v5726_v60  ;;  %v5820_v59 = vld [vmem:[#allocation2 + $0x21c] ss:$24 sps:$4 sm:$0xff]   ;;  %v5815_v60 = vld [vmem:[#allocation2 + $0x810] ss:$24 sps:$4 sm:$0xff]  }
  0x83   :  { %1956 = vmatprep.subr.bf16.mxu1 %v5730_v61  ;;  %v5823_v61 = vld [vmem:[#allocation2 + $0x7e4] ss:$24 sps:$4 sm:$0xff]  }
  0x85   :  { %1916 = vmatpush2.bf16.msra.mxu0 %v5729_v62  ;;  %v5818_v62 = vld [vmem:[#allocation2 + $0x218] ss:$24 sps:$4 sm:$0xff]  }
  0x86   :  { %1917 = vmatprep.subr.bf16.mxu0 %v5733_v63  ;;  %1957 = vmatpush2.bf16.msra.mxu1 %v5732_v0  ;;  %v5826_v63 = vld [vmem:[#allocation2 + $0x1ec] ss:$24 sps:$4 sm:$0xff]   ;;  %v5821_v0 = vld [vmem:[#allocation2 + $0x7e0] ss:$24 sps:$4 sm:$0xff]  }
  0x87   :  { %1958 = vmatprep.subr.bf16.mxu1 %v5736_v1  ;;  %v5829_v1 = vld [vmem:[#allocation2 + $0x7b4] ss:$24 sps:$4 sm:$0xff]  }
  0x89   :  { %1918 = vmatpush2.bf16.msra.mxu0 %v5735_v2  ;;  %v5824_v2 = vld [vmem:[#allocation2 + $0x1e8] ss:$24 sps:$4 sm:$0xff]  }
  0x8a   :  { %1969 = vmatprep.subr.bf16.mxu0 %v5743_v3  ;;  %1959 = vmatpush2.bf16.msra.mxu1 %v5739_v4  ;;  %v5832_v3 = vld [vmem:[#allocation2 + $0x1bc] ss:$24 sps:$4 sm:$0xff]   ;;  %v5827_v4 = vld [vmem:[#allocation2 + $0x7b0] ss:$24 sps:$4 sm:$0xff]  }
  0x8b   :  { %2010 = vmatprep.subr.bf16.mxu1 %v5748_v6  ;;  %v5835_v6 = vld [vmem:[#allocation2 + $0x784] ss:$24 sps:$4 sm:$0xff]  }
  0x8c   :  { %1920 = vmatmul.mubr.bf16.vlgmr.msra.gmra.mxu0 %v6773_v5 }
  0x8d   :  { %1970 = vmatpush1.bf16.msra.mxu0 %v5741_v7  ;;  %1961 = vmatmul.mubr.bf16.vlgmr.msra.gmra.mxu1 %v6775_v8  ;;  %v5830_v7 = vld [vmem:[#allocation2 + $0x1b8] ss:$24 sps:$4 sm:$0xff]  }
  0x8e   :  { %1971 = vmatprep.subr.bf16.mxu0 %v5751_v9  ;;  %2011 = vmatpush1.bf16.msra.mxu1 %v5746_v10  ;;  %v5838_v9 = vld [vmem:[#allocation2 + $0x18c] ss:$24 sps:$4 sm:$0xff]   ;;  %v5833_v10 = vld [vmem:[#allocation2 + $0x780] ss:$24 sps:$4 sm:$0xff]  }
  0x8f   :  { %2042 = vmatprep.mubr.bf16.mxu1 %v6764_v48  ;;  %2012 = vmatprep.subr.bf16.mxu1 %v5754_v11  ;;  %v5843_v11 = vld [vmem:[#allocation2 + $0x45c] ss:$24 sps:$4 sm:$0xff]  }
  0x90   :  { %2001 = vmatprep.mubr.bf16.mxu0 %v6787_v34 }
  0x91   :  { %1972 = vmatpush1.bf16.msra.mxu0 %v5749_v12  ;;  %v5836_v12 = vld [vmem:[#allocation2 + $0x188] ss:$24 sps:$4 sm:$0xff]  }
  0x92   :  { %1973 = vmatprep.subr.bf16.mxu0 %v5757_v13  ;;  %2013 = vmatpush1.bf16.msra.mxu1 %v5752_v14  ;;  %v6792_v13 = vcombine.low %v6783_v32, %v6783_v32  ;;  %v5846_v14 = vld [vmem:[#allocation2 + $0x75c] ss:$24 sps:$4 sm:$0xff]   ;;  %v5873_v32 = vld [vmem:[#allocation2 + $0x36c] ss:$24 sps:$4 sm:$0xff]  }
  0x93   :  { %2014 = vmatprep.subr.bf16.mxu1 %v5760_v15  ;;  %v5841_v15 = vld [vmem:[#allocation2 + $0x458] ss:$24 sps:$4 sm:$0xff]  }
  0x95   :  { %1974 = vmatpush1.bf16.msra.mxu0 %v5755_v16  ;;  %v5849_v16 = vld [vmem:[#allocation2 + $0x42c] ss:$24 sps:$4 sm:$0xff]  }
  0x96   :  { %1975 = vmatprep.subr.bf16.mxu0 %v5763_v17  ;;  %2015 = vmatpush1.bf16.msra.mxu1 %v5758_v18  ;;  %v5844_v17 = vld [vmem:[#allocation2 + $0x758] ss:$24 sps:$4 sm:$0xff]   ;;  %v5852_v18 = vld [vmem:[#allocation2 + $0x72c] ss:$24 sps:$4 sm:$0xff]  }
  0x97   :  { %2016 = vmatprep.subr.bf16.mxu1 %v5766_v19  ;;  %v5847_v19 = vld [vmem:[#allocation2 + $0x428] ss:$24 sps:$4 sm:$0xff]  }
  0x99   :  { %1976 = vmatpush1.bf16.msra.mxu0 %v5761_v20  ;;  %v5855_v20 = vld [vmem:[#allocation2 + $0x3fc] ss:$24 sps:$4 sm:$0xff]  }
  0x9a   :  { %1977 = vmatprep.subr.bf16.mxu0 %v5769_v21  ;;  %2017 = vmatpush1.bf16.msra.mxu1 %v5764_v22  ;;  %v5850_v21 = vld [vmem:[#allocation2 + $0x728] ss:$24 sps:$4 sm:$0xff]   ;;  %v5858_v22 = vld [vmem:[#allocation2 + $0x6fc] ss:$24 sps:$4 sm:$0xff]  }
  0x9b   :  { %2018 = vmatprep.subr.bf16.mxu1 %v5772_v23  ;;  %v5853_v23 = vld [vmem:[#allocation2 + $0x3f8] ss:$24 sps:$4 sm:$0xff]  }
  0x9d   :  { %1978 = vmatpush1.bf16.msra.mxu0 %v5767_v24  ;;  %v5861_v24 = vld [vmem:[#allocation2 + $0x3cc] ss:$24 sps:$4 sm:$0xff]  }
  0x9e   :  { %1979 = vmatprep.subr.bf16.mxu0 %v5775_v25  ;;  %2019 = vmatpush1.bf16.msra.mxu1 %v5770_v26  ;;  %v5856_v25 = vld [vmem:[#allocation2 + $0x6f8] ss:$24 sps:$4 sm:$0xff]   ;;  %v5864_v26 = vld [vmem:[#allocation2 + $0x6cc] ss:$24 sps:$4 sm:$0xff]  }
  0x9f   :  { %2020 = vmatprep.subr.bf16.mxu1 %v5778_v27  ;;  %v5859_v27 = vld [vmem:[#allocation2 + $0x3c8] ss:$24 sps:$4 sm:$0xff]  }
  0xa1   :  { %1980 = vmatpush1.bf16.msra.mxu0 %v5773_v28  ;;  %v5867_v28 = vld [vmem:[#allocation2 + $0x39c] ss:$24 sps:$4 sm:$0xff]  }
  0xa2   :  { %1981 = vmatprep.subr.bf16.mxu0 %v5781_v29  ;;  %2021 = vmatpush1.bf16.msra.mxu1 %v5776_v30  ;;  %v5862_v29 = vld [vmem:[#allocation2 + $0x6c8] ss:$24 sps:$4 sm:$0xff]   ;;  %v5870_v30 = vld [vmem:[#allocation2 + $0x69c] ss:$24 sps:$4 sm:$0xff]  }
  0xa3   :  { %2022 = vmatprep.subr.bf16.mxu1 %v5784_v31  ;;  %v5865_v31 = vld [vmem:[#allocation2 + $0x398] ss:$24 sps:$4 sm:$0xff]  }
  0xa5   :  { %1982 = vmatpush1.bf16.msra.mxu0 %v5779_v33  ;;  %v5868_v33 = vld [vmem:[#allocation2 + $0x698] ss:$24 sps:$4 sm:$0xff]  }
  0xa6   :  { %1983 = vmatprep.subr.bf16.mxu0 %v5787_v35  ;;  %2023 = vmatpush1.bf16.msra.mxu1 %v5782_v36  ;;  %v5876_v35 = vld [vmem:[#allocation2 + $0x66c] ss:$24 sps:$4 sm:$0xff]   ;;  %v5871_v36 = vld [vmem:[#allocation2 + $0x368] ss:$24 sps:$4 sm:$0xff]  }
  0xa7   :  { %2024 = vmatprep.subr.bf16.mxu1 %v5790_v37  ;;  %v5879_v37 = vld [vmem:[#allocation2 + $0x33c] ss:$24 sps:$4 sm:$0xff]  }
  0xa9   :  { %1984 = vmatpush1.bf16.msra.mxu0 %v5785_v38  ;;  %v5874_v38 = vld [vmem:[#allocation2 + $0x668] ss:$24 sps:$4 sm:$0xff]  }
  0xaa   :  { %1985 = vmatprep.subr.bf16.mxu0 %v5793_v39  ;;  %2025 = vmatpush1.bf16.msra.mxu1 %v5788_v40  ;;  %v5882_v39 = vld [vmem:[#allocation2 + $0x63c] ss:$24 sps:$4 sm:$0xff]   ;;  %v5877_v40 = vld [vmem:[#allocation2 + $0x338] ss:$24 sps:$4 sm:$0xff]  }
  0xab   :  { %2026 = vmatprep.subr.bf16.mxu1 %v5796_v41  ;;  %v5885_v41 = vld [vmem:[#allocation2 + $0x30c] ss:$24 sps:$4 sm:$0xff]  }
  0xad   :  { %1986 = vmatpush2.bf16.msra.mxu0 %v5791_v42  ;;  %v5880_v42 = vld [vmem:[#allocation2 + $0x638] ss:$24 sps:$4 sm:$0xff]  }
  0xae   :  { %1987 = vmatprep.subr.bf16.mxu0 %v5799_v43  ;;  %2027 = vmatpush2.bf16.msra.mxu1 %v5794_v44  ;;  %v5888_v43 = vld [vmem:[#allocation2 + $0x60c] ss:$24 sps:$4 sm:$0xff]   ;;  %v5883_v44 = vld [vmem:[#allocation2 + $0x308] ss:$24 sps:$4 sm:$0xff]  }
  0xaf   :  { %2028 = vmatprep.subr.bf16.mxu1 %v5802_v45  ;;  %v5891_v45 = vld [vmem:[#allocation2 + $0x5dc] ss:$24 sps:$4 sm:$0xff]  }
  0xb1   :  { %1988 = vmatpush2.bf16.msra.mxu0 %v5797_v46  ;;  %v5886_v46 = vld [vmem:[#allocation2 + $0x608] ss:$24 sps:$4 sm:$0xff]  }
  0xb2   :  { %1989 = vmatprep.subr.bf16.mxu0 %v5805_v47  ;;  %2029 = vmatpush2.bf16.msra.mxu1 %v5800_v49  ;;  %v5894_v47 = vld [vmem:[#allocation2 + $0x8dc] ss:$24 sps:$4 sm:$0xff]   ;;  %v5889_v49 = vld [vmem:[#allocation2 + $0x5d8] ss:$24 sps:$4 sm:$0xff]  }
  0xb3   :  { %2030 = vmatprep.subr.bf16.mxu1 %v5808_v50  ;;  %v5897_v50 = vld [vmem:[#allocation2 + $0x5ac] ss:$24 sps:$4 sm:$0xff]  }
  0xb5   :  { %1990 = vmatpush2.bf16.msra.mxu0 %v5803_v51  ;;  %v5892_v51 = vld [vmem:[#allocation2 + $0x8d8] ss:$24 sps:$4 sm:$0xff]  }
  0xb6   :  { %1991 = vmatprep.subr.bf16.mxu0 %v5811_v53  ;;  %2031 = vmatpush2.bf16.msra.mxu1 %v5806_v54  ;;  %v5900_v53 = vld [vmem:[#allocation2 + $0x8ac] ss:$24 sps:$4 sm:$0xff]   ;;  %v5895_v54 = vld [vmem:[#allocation2 + $0x5a8] ss:$24 sps:$4 sm:$0xff]  }
  0xb7   :  { %2032 = vmatprep.subr.bf16.mxu1 %v5814_v55  ;;  %v5903_v55 = vld [vmem:[#allocation2 + $0x57c] ss:$24 sps:$4 sm:$0xff]  }
  0xb9   :  { %1992 = vmatpush2.bf16.msra.mxu0 %v5809_v56  ;;  %v5898_v56 = vld [vmem:[#allocation2 + $0x8a8] ss:$24 sps:$4 sm:$0xff]  }
  0xba   :  { %1993 = vmatprep.subr.bf16.mxu0 %v5817_v57  ;;  %2033 = vmatpush2.bf16.msra.mxu1 %v5812_v58  ;;  %v5906_v57 = vld [vmem:[#allocation2 + $0x87c] ss:$24 sps:$4 sm:$0xff]   ;;  %v5901_v58 = vld [vmem:[#allocation2 + $0x578] ss:$24 sps:$4 sm:$0xff]  }
  0xbb   :  { %2034 = vmatprep.subr.bf16.mxu1 %v5820_v59  ;;  %v5909_v59 = vld [vmem:[#allocation2 + $0x54c] ss:$24 sps:$4 sm:$0xff]  }
  0xbd   :  { %1994 = vmatpush2.bf16.msra.mxu0 %v5815_v60  ;;  %v5904_v60 = vld [vmem:[#allocation2 + $0x878] ss:$24 sps:$4 sm:$0xff]  }
  0xbe   :  { %1995 = vmatprep.subr.bf16.mxu0 %v5823_v61  ;;  %2035 = vmatpush2.bf16.msra.mxu1 %v5818_v62  ;;  %v5912_v61 = vld [vmem:[#allocation2 + $0x84c] ss:$24 sps:$4 sm:$0xff]   ;;  %v5907_v62 = vld [vmem:[#allocation2 + $0x548] ss:$24 sps:$4 sm:$0xff]  }
  0xbf   :  { %2036 = vmatprep.subr.bf16.mxu1 %v5826_v63  ;;  %v5915_v63 = vld [vmem:[#allocation2 + $0x51c] ss:$24 sps:$4 sm:$0xff]  }
  0xc1   :  { %1996 = vmatpush2.bf16.msra.mxu0 %v5821_v0  ;;  %v5910_v0 = vld [vmem:[#allocation2 + $0x848] ss:$24 sps:$4 sm:$0xff]  }
  0xc2   :  { %1997 = vmatprep.subr.bf16.mxu0 %v5829_v1  ;;  %2037 = vmatpush2.bf16.msra.mxu1 %v5824_v2  ;;  %v5918_v1 = vld [vmem:[#allocation2 + $0x81c] ss:$24 sps:$4 sm:$0xff]   ;;  %v5913_v2 = vld [vmem:[#allocation2 + $0x518] ss:$24 sps:$4 sm:$0xff]  }
  0xc3   :  { %2038 = vmatprep.subr.bf16.mxu1 %v5832_v3  ;;  %v5921_v3 = vld [vmem:[#allocation2 + $0x4ec] ss:$24 sps:$4 sm:$0xff]  }
  0xc5   :  { %1998 = vmatpush2.bf16.msra.mxu0 %v5827_v4  ;;  %v5916_v4 = vld [vmem:[#allocation2 + $0x818] ss:$24 sps:$4 sm:$0xff]  }
  0xc6   :  { %1999 = vmatprep.subr.bf16.mxu0 %v5835_v6  ;;  %2039 = vmatpush2.bf16.msra.mxu1 %v5830_v7  ;;  %v5924_v6 = vld [vmem:[#allocation2 + $0x7ec] ss:$24 sps:$4 sm:$0xff]   ;;  %v5919_v7 = vld [vmem:[#allocation2 + $0x4e8] ss:$24 sps:$4 sm:$0xff]  }
  0xc7   :  { %2040 = vmatprep.subr.bf16.mxu1 %v5838_v9  ;;  %v5927_v9 = vld [vmem:[#allocation2 + $0x4bc] ss:$24 sps:$4 sm:$0xff]  }
  0xc9   :  { %2000 = vmatpush2.bf16.msra.mxu0 %v5833_v10  ;;  %v5922_v10 = vld [vmem:[#allocation2 + $0x7e8] ss:$24 sps:$4 sm:$0xff]  }
  0xca   :  { %2051 = vmatprep.subr.bf16.mxu0 %v5843_v11  ;;  %2041 = vmatpush2.bf16.msra.mxu1 %v5836_v12  ;;  %v5930_v11 = vld [vmem:[#allocation2 + $0x7bc] ss:$24 sps:$4 sm:$0xff]   ;;  %v5925_v12 = vld [vmem:[#allocation2 + $0x4b8] ss:$24 sps:$4 sm:$0xff]  }
  0xcb   :  { %2092 = vmatprep.subr.bf16.mxu1 %v5846_v14  ;;  %v5933_v14 = vld [vmem:[#allocation2 + $0x48c] ss:$24 sps:$4 sm:$0xff]  }
  0xcc   :  { %2002 = vmatmul.mubr.bf16.vlgmr.msra.gmra.mxu0 %v6792_v13 }
  0xcd   :  { %2052 = vmatpush1.bf16.msra.mxu0 %v5841_v15  ;;  %2083 = vmatprep.mubr.bf16.mxu0 %v6770_v52  ;;  %v5928_v15 = vld [vmem:[#allocation2 + $0x7b8] ss:$24 sps:$4 sm:$0xff]  }
  0xce   :  { %2043 = vmatmul.mubr.bf16.vlgmr.msra.gmra.mxu1 %v6773_v5  ;;  %2053 = vmatprep.subr.bf16.mxu0 %v5849_v16  ;;  %v5936_v16 = vld [vmem:[#allocation2 + $0x78c] ss:$24 sps:$4 sm:$0xff]  }
  0xcf   :  { %2093 = vmatpush1.bf16.msra.mxu1 %v5844_v17  ;;  %2124 = vmatprep.mubr.bf16.mxu1 %v6787_v34  ;;  %v5931_v17 = vld [vmem:[#allocation2 + $0x488] ss:$24 sps:$4 sm:$0xff]  }
  0xd0   :  { %2094 = vmatprep.subr.bf16.mxu1 %v5852_v18  ;;  %v5939_v18 = vld [vmem:[#allocation2 + $0x164] ss:$24 sps:$4 sm:$0xff]  }
  0xd1   :  { %2054 = vmatpush1.bf16.msra.mxu0 %v5847_v19  ;;  %v5934_v19 = vld [vmem:[#allocation2 + $0x788] ss:$24 sps:$4 sm:$0xff]  }
  0xd2   :  { %2055 = vmatprep.subr.bf16.mxu0 %v5855_v20  ;;  %v5942_v20 = vld [vmem:[#allocation2 + $0x464] ss:$24 sps:$4 sm:$0xff]  }
  0xd3   :  { %2095 = vmatpush1.bf16.msra.mxu1 %v5850_v21  ;;  %v5937_v21 = vld [vmem:[#allocation2 + $0x160] ss:$24 sps:$4 sm:$0xff]  }
  0xd4   :  { %2096 = vmatprep.subr.bf16.mxu1 %v5858_v22  ;;  %v5945_v22 = vld [vmem:[#allocation2 + $0x134] ss:$24 sps:$4 sm:$0xff]  }
  0xd5   :  { %2056 = vmatpush1.bf16.msra.mxu0 %v5853_v23  ;;  %v5940_v23 = vld [vmem:[#allocation2 + $0x460] ss:$24 sps:$4 sm:$0xff]  }
  0xd6   :  { %2057 = vmatprep.subr.bf16.mxu0 %v5861_v24  ;;  %v5948_v24 = vld [vmem:[#allocation2 + $0x434] ss:$24 sps:$4 sm:$0xff]  }
  0xd7   :  { %2097 = vmatpush1.bf16.msra.mxu1 %v5856_v25  ;;  %v5943_v25 = vld [vmem:[#allocation2 + $0x130] ss:$24 sps:$4 sm:$0xff]  }
  0xd8   :  { %2098 = vmatprep.subr.bf16.mxu1 %v5864_v26  ;;  %v5951_v26 = vld [vmem:[#allocation2 + $0x104] ss:$24 sps:$4 sm:$0xff]  }
  0xd9   :  { %2058 = vmatpush1.bf16.msra.mxu0 %v5859_v27  ;;  %v5946_v27 = vld [vmem:[#allocation2 + $0x430] ss:$24 sps:$4 sm:$0xff]  }
  0xda   :  { %2059 = vmatprep.subr.bf16.mxu0 %v5867_v28  ;;  %v5954_v28 = vld [vmem:[#allocation2 + $0x404] ss:$24 sps:$4 sm:$0xff]  }
  0xdb   :  { %2099 = vmatpush1.bf16.msra.mxu1 %v5862_v29  ;;  %v5949_v29 = vld [vmem:[#allocation2 + $0x100] ss:$24 sps:$4 sm:$0xff]  }
  0xdc   :  { %2100 = vmatprep.subr.bf16.mxu1 %v5870_v30  ;;  %v5957_v30 = vld [vmem:[#allocation2 + $0xd4] ss:$24 sps:$4 sm:$0xff]  }
  0xdd   :  { %2060 = vmatpush1.bf16.msra.mxu0 %v5865_v31  ;;  %v5952_v31 = vld [vmem:[#allocation2 + $0x400] ss:$24 sps:$4 sm:$0xff]  }
  0xde   :  { %2061 = vmatprep.subr.bf16.mxu0 %v5873_v32  ;;  %v5960_v32 = vld [vmem:[#allocation2 + $0x3d4] ss:$24 sps:$4 sm:$0xff]  }
  0xdf   :  { %2101 = vmatpush1.bf16.msra.mxu1 %v5868_v33  ;;  %v5963_v33 = vld [vmem:[#allocation2 + $0xa4] ss:$24 sps:$4 sm:$0xff]  }
  0xe0   :  { %2102 = vmatprep.subr.bf16.mxu1 %v5876_v35  ;;  %v5958_v35 = vld [vmem:[#allocation2 + $0x3d0] ss:$24 sps:$4 sm:$0xff]  }
  0xe1   :  { %2062 = vmatpush1.bf16.msra.mxu0 %v5871_v36  ;;  %v5966_v36 = vld [vmem:[#allocation2 + $0x3a4] ss:$24 sps:$4 sm:$0xff]  }
  0xe2   :  { %2063 = vmatprep.subr.bf16.mxu0 %v5879_v37  ;;  %v5969_v37 = vld [vmem:[#allocation2 + $0x74] ss:$24 sps:$4 sm:$0xff]  }
  0xe3   :  { %2103 = vmatpush1.bf16.msra.mxu1 %v5874_v38  ;;  %v5964_v38 = vld [vmem:[#allocation2 + $0x3a0] ss:$24 sps:$4 sm:$0xff]  }
  0xe4   :  { %2104 = vmatprep.subr.bf16.mxu1 %v5882_v39  ;;  %v5972_v39 = vld [vmem:[#allocation2 + $0x374] ss:$24 sps:$4 sm:$0xff]  }
  0xe5   :  { %2064 = vmatpush1.bf16.msra.mxu0 %v5877_v40  ;;  %v5967_v40 = vld [vmem:[#allocation2 + $0x70] ss:$24 sps:$4 sm:$0xff]  }
  0xe6   :  { %2065 = vmatprep.subr.bf16.mxu0 %v5885_v41  ;;  %v5975_v41 = vld [vmem:[#allocation2 + $0x44] ss:$24 sps:$4 sm:$0xff]  }
  0xe7   :  { %2105 = vmatpush1.bf16.msra.mxu1 %v5880_v42  ;;  %v5970_v42 = vld [vmem:[#allocation2 + $0x370] ss:$24 sps:$4 sm:$0xff]  }
  0xe8   :  { %2106 = vmatprep.subr.bf16.mxu1 %v5888_v43  ;;  %v5978_v43 = vld [vmem:[#allocation2 + $0x344] ss:$24 sps:$4 sm:$0xff]  }
  0xe9   :  { %2066 = vmatpush1.bf16.msra.mxu0 %v5883_v44  ;;  %v5973_v44 = vld [vmem:[#allocation2 + $0x40] ss:$24 sps:$4 sm:$0xff]  }
  0xea   :  { %2067 = vmatprep.subr.bf16.mxu0 %v5891_v45  ;;  %v5981_v45 = vld [vmem:[#allocation2 + $0x14] ss:$24 sps:$4 sm:$0xff]  }
  0xeb   :  { %2107 = vmatpush1.bf16.msra.mxu1 %v5886_v46  ;;  %v5976_v46 = vld [vmem:[#allocation2 + $0x340] ss:$24 sps:$4 sm:$0xff]  }
  0xec   :  { %2108 = vmatprep.subr.bf16.mxu1 %v5894_v47  ;;  %v5984_v47 = vld [vmem:[#allocation2 + $0x314] ss:$24 sps:$4 sm:$0xff]  }
  0xed   :  { %2068 = vmatpush2.bf16.msra.mxu0 %v5889_v49  ;;  %v5979_v49 = vld [vmem:[#allocation2 + $0x10] ss:$24 sps:$4 sm:$0xff]  }
  0xee   :  { %2069 = vmatprep.subr.bf16.mxu0 %v5897_v50  ;;  %v5987_v50 = vld [vmem:[#allocation2 + $0x2e4] ss:$24 sps:$4 sm:$0xff]  }
  0xef   :  { %2109 = vmatpush2.bf16.msra.mxu1 %v5892_v51  ;;  %v5982_v51 = vld [vmem:[#allocation2 + $0x310] ss:$24 sps:$4 sm:$0xff]  }
  0xf0   :  { %2110 = vmatprep.subr.bf16.mxu1 %v5900_v53  ;;  %v5990_v53 = vld [vmem:[#allocation2 + $0x5e4] ss:$24 sps:$4 sm:$0xff]  }
  0xf1   :  { %2070 = vmatpush2.bf16.msra.mxu0 %v5895_v54  ;;  %v5985_v54 = vld [vmem:[#allocation2 + $0x2e0] ss:$24 sps:$4 sm:$0xff]  }
  0xf2   :  { %2071 = vmatprep.subr.bf16.mxu0 %v5903_v55  ;;  %v5993_v55 = vld [vmem:[#allocation2 + $0x2b4] ss:$24 sps:$4 sm:$0xff]  }
  0xf3   :  { %2111 = vmatpush2.bf16.msra.mxu1 %v5898_v56  ;;  %v5988_v56 = vld [vmem:[#allocation2 + $0x5e0] ss:$24 sps:$4 sm:$0xff]  }
  0xf4   :  { %2112 = vmatprep.subr.bf16.mxu1 %v5906_v57  ;;  %v5991_v57 = vld [vmem:[#allocation2 + $0x2b0] ss:$24 sps:$4 sm:$0xff]  }
  0xf5   :  { %2072 = vmatpush2.bf16.msra.mxu0 %v5901_v58  ;;  %v5996_v58 = vld [vmem:[#allocation2 + $0x5b4] ss:$24 sps:$4 sm:$0xff]  }
  0xf6   :  { %2073 = vmatprep.subr.bf16.mxu0 %v5909_v59  ;;  %v5994_v59 = vld [vmem:[#allocation2 + $0x5b0] ss:$24 sps:$4 sm:$0xff]  }
  0xf7   :  { %2113 = vmatpush2.bf16.msra.mxu1 %v5904_v60  ;;  %v5999_v60 = vld [vmem:[#allocation2 + $0x284] ss:$24 sps:$4 sm:$0xff]  }
  0xf8   :  { %2114 = vmatprep.subr.bf16.mxu1 %v5912_v61  ;;  %v6002_v61 = vld [vmem:[#allocation2 + $0x584] ss:$24 sps:$4 sm:$0xff]  }
  0xf9   :  { %2074 = vmatpush2.bf16.msra.mxu0 %v5907_v62  ;;  %v5997_v62 = vld [vmem:[#allocation2 + $0x280] ss:$24 sps:$4 sm:$0xff]  }
  0xfa   :  { %2075 = vmatprep.subr.bf16.mxu0 %v5915_v63  ;;  %v6000_v63 = vld [vmem:[#allocation2 + $0x580] ss:$24 sps:$4 sm:$0xff]  }
  0xfb   :  { %2115 = vmatpush2.bf16.msra.mxu1 %v5910_v0  ;;  %v6005_v0 = vld [vmem:[#allocation2 + $0x254] ss:$24 sps:$4 sm:$0xff]  }
  0xfc   :  { %2116 = vmatprep.subr.bf16.mxu1 %v5918_v1  ;;  %v6008_v1 = vld [vmem:[#allocation2 + $0x554] ss:$24 sps:$4 sm:$0xff]  }
  0xfd   :  { %2076 = vmatpush2.bf16.msra.mxu0 %v5913_v2  ;;  %v6003_v2 = vld [vmem:[#allocation2 + $0x250] ss:$24 sps:$4 sm:$0xff]  }
  0xfe   :  { %2077 = vmatprep.subr.bf16.mxu0 %v5921_v3  ;;  %v6006_v3 = vld [vmem:[#allocation2 + $0x550] ss:$24 sps:$4 sm:$0xff]  }
  0xff   :  { %2117 = vmatpush2.bf16.msra.mxu1 %v5916_v4  ;;  %v6011_v4 = vld [vmem:[#allocation2 + $0x224] ss:$24 sps:$4 sm:$0xff]  }
 0x100   :  { %2118 = vmatprep.subr.bf16.mxu1 %v5924_v6  ;;  %v6014_v6 = vld [vmem:[#allocation2 + $0x524] ss:$24 sps:$4 sm:$0xff]  }
 0x101   :  { %2078 = vmatpush2.bf16.msra.mxu0 %v5919_v7  ;;  %v6009_v7 = vld [vmem:[#allocation2 + $0x220] ss:$24 sps:$4 sm:$0xff]  }
 0x102   :  { %2079 = vmatprep.subr.bf16.mxu0 %v5927_v9  ;;  %v6012_v9 = vld [vmem:[#allocation2 + $0x520] ss:$24 sps:$4 sm:$0xff]  }
 0x103   :  { %2119 = vmatpush2.bf16.msra.mxu1 %v5922_v10  ;;  %v6017_v10 = vld [vmem:[#allocation2 + $0x1f4] ss:$24 sps:$4 sm:$0xff]  }
 0x104   :  { %2120 = vmatprep.subr.bf16.mxu1 %v5930_v11  ;;  %v6020_v11 = vld [vmem:[#allocation2 + $0x4f4] ss:$24 sps:$4 sm:$0xff]  }
 0x105   :  { %2080 = vmatpush2.bf16.msra.mxu0 %v5925_v12  ;;  %v6015_v12 = vld [vmem:[#allocation2 + $0x1f0] ss:$24 sps:$4 sm:$0xff]  }
 0x106   :  { %2081 = vmatprep.subr.bf16.mxu0 %v5933_v14  ;;  %v6018_v14 = vld [vmem:[#allocation2 + $0x4f0] ss:$24 sps:$4 sm:$0xff]  }
 0x107   :  { %2121 = vmatpush2.bf16.msra.mxu1 %v5928_v15  ;;  %v6023_v15 = vld [vmem:[#allocation2 + $0x1c4] ss:$24 sps:$4 sm:$0xff]  }
 0x108   :  { %2122 = vmatprep.subr.bf16.mxu1 %v5936_v16  ;;  %v6026_v16 = vld [vmem:[#allocation2 + $0x4c4] ss:$24 sps:$4 sm:$0xff]  }
 0x109   :  { %2082 = vmatpush2.bf16.msra.mxu0 %v5931_v17  ;;  %v6021_v17 = vld [vmem:[#allocation2 + $0x1c0] ss:$24 sps:$4 sm:$0xff]  }
 0x10a   :  { %2133 = vmatprep.subr.bf16.mxu0 %v5939_v18  ;;  %v6029_v18 = vld [vmem:[#allocation2 + $0x194] ss:$24 sps:$4 sm:$0xff]  }
 0x10b   :  { %2123 = vmatpush2.bf16.msra.mxu1 %v5934_v19  ;;  %v6024_v19 = vld [vmem:[#allocation2 + $0x4c0] ss:$24 sps:$4 sm:$0xff]  }
 0x10c   :  { %2084 = vmatmul.mubr.bf16.vlgmr.msra.gmra.mxu0 %v6775_v8  ;;  %2174 = vmatprep.subr.bf16.mxu1 %v5942_v20  ;;  %v6032_v20 = vld [vmem:[#allocation2 + $0x494] ss:$24 sps:$4 sm:$0xff]  }
 0x10d   :  { %2134 = vmatpush1.bf16.msra.mxu0 %v5937_v21  ;;  %2165 = vmatprep.mubr.bf16.mxu0 %v6764_v48  ;;  %v5955_v48 = vld [vmem:[#allocation2 + $0xd0] ss:$24 sps:$4 sm:$0xff]  }
 0x10e   :  { %2125 = vmatmul.mubr.bf16.vlgmr.msra.gmra.mxu1 %v6792_v13  ;;  %2135 = vmatprep.subr.bf16.mxu0 %v5945_v22  ;;  %v6027_v21 = vld [vmem:[#allocation2 + $0x190] ss:$24 sps:$4 sm:$0xff]   ;;  %v6035_v22 = vld [vmem:[#allocation2 + $0x764] ss:$24 sps:$4 sm:$0xff]  }
 0x10f   :  { %2175 = vmatpush1.bf16.msra.mxu1 %v5940_v23  ;;  %2206 = vmatprep.mubr.bf16.mxu1 %v6770_v52  ;;  %v5961_v52 = vld [vmem:[#allocation2 + $0xa0] ss:$24 sps:$4 sm:$0xff]   ;;  %v6030_v23 = vld [vmem:[#allocation2 + $0x490] ss:$24 sps:$4 sm:$0xff]  }
 0x110   :  { %2176 = vmatprep.subr.bf16.mxu1 %v5948_v24  ;;  %v6044_v24 = vld [vmem:[#allocation6 + $0x154] ss:$24 sps:$4 sm:$0xff]  }
 0x111   :  { %2136 = vmatpush1.bf16.msra.mxu0 %v5943_v25  ;;  %v6033_v25 = vld [vmem:[#allocation2 + $0x760] ss:$24 sps:$4 sm:$0xff]  }
 0x112   :  { %2137 = vmatprep.subr.bf16.mxu0 %v5951_v26  ;;  %v6038_v26 = vld [vmem:[#allocation2 + $0x734] ss:$24 sps:$4 sm:$0xff]  }
 0x113   :  { %2177 = vmatpush1.bf16.msra.mxu1 %v5946_v27  ;;  %v6042_v27 = vld [vmem:[#allocation6 + $0x150] ss:$24 sps:$4 sm:$0xff]  }
 0x114   :  { %2178 = vmatprep.subr.bf16.mxu1 %v5954_v28  ;;  %v6050_v28 = vld [vmem:[#allocation6 + $0x124] ss:$24 sps:$4 sm:$0xff]  }
 0x115   :  { %2138 = vmatpush1.bf16.msra.mxu0 %v5949_v29  ;;  %v6036_v29 = vld [vmem:[#allocation2 + $0x730] ss:$24 sps:$4 sm:$0xff]  }
 0x116   :  { %2139 = vmatprep.subr.bf16.mxu0 %v5957_v30 }
 0x117   :  { %2179 = vmatpush1.bf16.msra.mxu1 %v5952_v31  ;;  %v6041_v31 = vld [vmem:[#allocation2 + $0x704] ss:$24 sps:$4 sm:$0xff]  }
 0x118   :  { %2180 = vmatprep.subr.bf16.mxu1 %v5960_v32  ;;  %v6048_v32 = vld [vmem:[#allocation6 + $0x120] ss:$24 sps:$4 sm:$0xff]  }
 0x119   :  { %2140 = vmatpush1.bf16.msra.mxu0 %v5955_v48 }
 0x11a   :  { %2141 = vmatprep.subr.bf16.mxu0 %v5963_v33 }
 0x11b   :  { %2181 = vmatpush1.bf16.msra.mxu1 %v5958_v35  ;;  %v6056_v35 = vld [vmem:[#allocation6 + $0xf4] ss:$24 sps:$4 sm:$0xff]  }
 0x11c   :  { %2182 = vmatprep.subr.bf16.mxu1 %v5966_v36  ;;  %v6039_v36 = vld [vmem:[#allocation2 + $0x700] ss:$24 sps:$4 sm:$0xff]  }
 0x11d   :  { %2142 = vmatpush1.bf16.msra.mxu0 %v5961_v52 }
 0x11e   :  { %2143 = vmatprep.subr.bf16.mxu0 %v5969_v37 }
 0x11f   :  { %2183 = vmatpush1.bf16.msra.mxu1 %v5964_v38  ;;  %v6054_v38 = vld [vmem:[#allocation6 + $0xf0] ss:$24 sps:$4 sm:$0xff]  }
 0x120   :  { %2184 = vmatprep.subr.bf16.mxu1 %v5972_v39 }
 0x121   :  { %2144 = vmatpush1.bf16.msra.mxu0 %v5967_v40 }
 0x122   :  { %2145 = vmatprep.subr.bf16.mxu0 %v5975_v41  ;;  %v6045_v41 = vld [vmem:[#allocation2 + $0x6d0] ss:$24 sps:$4 sm:$0xff]  }
 0x123   :  { %2185 = vmatpush1.bf16.msra.mxu1 %v5970_v42  ;;  %v6053_v42 = vld [vmem:[#allocation2 + $0x6a4] ss:$24 sps:$4 sm:$0xff]  }
 0x124   :  { %2186 = vmatprep.subr.bf16.mxu1 %v5978_v43  ;;  %v6060_v43 = vld [vmem:[#allocation6 + $0xc0] ss:$24 sps:$4 sm:$0xff]  }
 0x125   :  { %2146 = vmatpush1.bf16.msra.mxu0 %v5973_v44  ;;  %v6068_v44 = vld [vmem:[#allocation6 + $0x94] ss:$24 sps:$4 sm:$0xff]  }
 0x126   :  { %2147 = vmatprep.subr.bf16.mxu0 %v5981_v45  ;;  %v6051_v45 = vld [vmem:[#allocation2 + $0x6a0] ss:$24 sps:$4 sm:$0xff]  }
 0x127   :  { %2187 = vmatpush1.bf16.msra.mxu1 %v5976_v46  ;;  %v6059_v46 = vld [vmem:[#allocation2 + $0x674] ss:$24 sps:$4 sm:$0xff]  }
 0x128   :  { %2188 = vmatprep.subr.bf16.mxu1 %v5984_v47  ;;  %v6066_v47 = vld [vmem:[#allocation6 + $0x90] ss:$24 sps:$4 sm:$0xff]  }
 0x129   :  { %2148 = vmatpush1.bf16.msra.mxu0 %v5979_v49  ;;  %v6074_v49 = vld [vmem:[#allocation6 + $0x64] ss:$24 sps:$4 sm:$0xff]  }
 0x12a   :  { %2149 = vmatprep.subr.bf16.mxu0 %v5987_v50  ;;  %v6057_v50 = vld [vmem:[#allocation2 + $0x670] ss:$24 sps:$4 sm:$0xff]  }
 0x12b   :  { %2189 = vmatpush1.bf16.msra.mxu1 %v5982_v51  ;;  %v6065_v51 = vld [vmem:[#allocation2 + $0x644] ss:$24 sps:$4 sm:$0xff]  }
 0x12c   :  { %2190 = vmatprep.subr.bf16.mxu1 %v5990_v53  ;;  %v6072_v53 = vld [vmem:[#allocation6 + $0x60] ss:$24 sps:$4 sm:$0xff]  }
 0x12d   :  { %2150 = vmatpush2.bf16.msra.mxu0 %v5985_v54  ;;  %v6080_v54 = vld [vmem:[#allocation6 + $0x34] ss:$24 sps:$4 sm:$0xff]  }
 0x12e   :  { %2151 = vmatprep.subr.bf16.mxu0 %v5993_v55  ;;  %v6063_v55 = vld [vmem:[#allocation2 + $0x640] ss:$24 sps:$4 sm:$0xff]  }
 0x12f   :  { %2191 = vmatpush2.bf16.msra.mxu1 %v5988_v56  ;;  %v6071_v56 = vld [vmem:[#allocation2 + $0x614] ss:$24 sps:$4 sm:$0xff]  }
 0x130   :  { %2192 = vmatprep.subr.bf16.mxu1 %v5996_v58  ;;  %v6086_v58 = vld [vmem:[#allocation6 + $0x4] ss:$24 sps:$4 sm:$0xff]  }
 0x131   :  { %2152 = vmatpush2.bf16.msra.mxu0 %v5991_v57  ;;  %v6078_v57 = vld [vmem:[#allocation6 + $0x30] ss:$24 sps:$4 sm:$0xff]  }
 0x132   :  { %2153 = vmatprep.subr.bf16.mxu0 %v5999_v60  ;;  %v6077_v60 = vld [vmem:[#allocation2 + $0x8e4] ss:$24 sps:$4 sm:$0xff]  }
 0x133   :  { %2193 = vmatpush2.bf16.msra.mxu1 %v5994_v59  ;;  %v6069_v59 = vld [vmem:[#allocation2 + $0x610] ss:$24 sps:$4 sm:$0xff]  }
 0x134   :  { %2194 = vmatprep.subr.bf16.mxu1 %v6002_v61  ;;  %v6084_v61 = vld [vmem:[#allocation6] ss:$24 sps:$4 sm:$0xff]  }
 0x135   :  { %2154 = vmatpush2.bf16.msra.mxu0 %v5997_v62  ;;  %v6092_v62 = vld [vmem:[#allocation6 + $0x2d4] ss:$24 sps:$4 sm:$0xff]  }
 0x136   :  { %2155 = vmatprep.subr.bf16.mxu0 %v6005_v0  ;;  %v6083_v0 = vld [vmem:[#allocation2 + $0x8b4] ss:$24 sps:$4 sm:$0xff]  }
 0x137   :  { %2195 = vmatpush2.bf16.msra.mxu1 %v6000_v63  ;;  %v6075_v63 = vld [vmem:[#allocation2 + $0x8e0] ss:$24 sps:$4 sm:$0xff]  }
 0x138   :  { %2196 = vmatprep.subr.bf16.mxu1 %v6008_v1  ;;  %v6090_v1 = vld [vmem:[#allocation6 + $0x2d0] ss:$24 sps:$4 sm:$0xff]  }
 0x139   :  { %2156 = vmatpush2.bf16.msra.mxu0 %v6003_v2  ;;  %v6098_v2 = vld [vmem:[#allocation6 + $0x2a4] ss:$24 sps:$4 sm:$0xff]  }
 0x13a   :  { %2157 = vmatprep.subr.bf16.mxu0 %v6011_v4  ;;  %v6089_v4 = vld [vmem:[#allocation2 + $0x884] ss:$24 sps:$4 sm:$0xff]  }
 0x13b   :  { %2197 = vmatpush2.bf16.msra.mxu1 %v6006_v3  ;;  %v6081_v3 = vld [vmem:[#allocation2 + $0x8b0] ss:$24 sps:$4 sm:$0xff]  }
 0x13c   :  { %2198 = vmatprep.subr.bf16.mxu1 %v6014_v6  ;;  %v6096_v6 = vld [vmem:[#allocation6 + $0x2a0] ss:$24 sps:$4 sm:$0xff]  }
 0x13d   :  { %2158 = vmatpush2.bf16.msra.mxu0 %v6009_v7  ;;  %v6104_v7 = vld [vmem:[#allocation6 + $0x274] ss:$24 sps:$4 sm:$0xff]  }
 0x13e   :  { %2159 = vmatprep.subr.bf16.mxu0 %v6017_v10  ;;  %v6095_v10 = vld [vmem:[#allocation2 + $0x854] ss:$24 sps:$4 sm:$0xff]  }
 0x13f   :  { %2199 = vmatpush2.bf16.msra.mxu1 %v6012_v9  ;;  %v6087_v9 = vld [vmem:[#allocation2 + $0x880] ss:$24 sps:$4 sm:$0xff]  }
 0x140   :  { %2200 = vmatprep.subr.bf16.mxu1 %v6020_v11  ;;  %v6102_v11 = vld [vmem:[#allocation6 + $0x270] ss:$24 sps:$4 sm:$0xff]  }
 0x141   :  { %2160 = vmatpush2.bf16.msra.mxu0 %v6015_v12  ;;  %v6110_v12 = vld [vmem:[#allocation6 + $0x244] ss:$24 sps:$4 sm:$0xff]  }
 0x142   :  { %2161 = vmatprep.subr.bf16.mxu0 %v6023_v15  ;;  %v6101_v15 = vld [vmem:[#allocation2 + $0x824] ss:$24 sps:$4 sm:$0xff]  }
 0x143   :  { %2201 = vmatpush2.bf16.msra.mxu1 %v6018_v14  ;;  %v6093_v14 = vld [vmem:[#allocation2 + $0x850] ss:$24 sps:$4 sm:$0xff]  }
 0x144   :  { %2202 = vmatprep.subr.bf16.mxu1 %v6026_v16  ;;  %v6108_v16 = vld [vmem:[#allocation6 + $0x240] ss:$24 sps:$4 sm:$0xff]  }
 0x145   :  { %2162 = vmatpush2.bf16.msra.mxu0 %v6021_v17  ;;  %v6116_v17 = vld [vmem:[#allocation6 + $0x214] ss:$24 sps:$4 sm:$0xff]  }
 0x146   :  { %2163 = vmatprep.subr.bf16.mxu0 %v6029_v18  ;;  %v396_v18 = vlaneseq }
 0x147   :  { %2203 = vmatpush2.bf16.msra.mxu1 %v6024_v19  ;;  %v6099_v19 = vld [vmem:[#allocation2 + $0x820] ss:$24 sps:$4 sm:$0xff]  }
 0x148   :  { %2204 = vmatprep.subr.bf16.mxu1 %v6032_v20  ;;  %v6107_v20 = vld [vmem:[#allocation2 + $0x7f4] ss:$24 sps:$4 sm:$0xff]  }
 0x149   :  { %2164 = vmatpush2.bf16.msra.mxu0 %v6027_v21  ;;  %v6114_v21 = vld [vmem:[#allocation6 + $0x210] ss:$24 sps:$4 sm:$0xff]  }
 0x14a   :  { %2215 = vmatprep.subr.bf16.mxu0 %v6035_v22  ;;  %v6122_v22 = vld [vmem:[#allocation6 + $0x1e4] ss:$24 sps:$4 sm:$0xff]  }
 0x14b   :  { %2205 = vmatpush2.bf16.msra.mxu1 %v6030_v23  ;;  %v6813_v23 = vshrl.u32 %v396_v18, 7  ;;  %v6155_v18 = vld [vmem:[#allocation6 + $0x5d4] ss:$24 sps:$4 sm:$0xff]  }
 0x14c   :  { %v6802_v30 = vpop.f32.mrf.mxu0  ;;  %2166 = vmatmul.mubr.bf16.vlgmr.msra.gmra.mxu0 %v6773_v5  ;;  %4028 = vmatprep.subr.bf16.mxu1 %v6044_v24  ;;  %v6047_v5 = vld [vmem:[#allocation2 + $0x6d4] ss:$24 sps:$4 sm:$0xff]   ;;  %v6105_v24 = vld [vmem:[#allocation2 + $0x7f0] ss:$24 sps:$4 sm:$0xff]  }
 0x14d   :  { %2216 = vmatpush1.bf16.msra.mxu0 %v6033_v25  ;;  %2247 = vmatprep.mubr.bf16.mxu0 %v6787_v34  ;;  %v6808_v33 = vpop.f32.mrf.mxu1  ;;  %v6062_v34 = vld [vmem:[#allocation6 + $0xc4] ss:$24 sps:$4 sm:$0xff]  }
 0x14e   :  { %v6806_v48 = vpop.f32.mrf.mxu0  ;;  %2207 = vmatmul.mubr.bf16.vlgmr.msra.gmra.mxu1 %v6775_v8  ;;  %2217 = vmatprep.subr.bf16.mxu0 %v6038_v26  ;;  %v6113_v25 = vld [vmem:[#allocation2 + $0x7c4] ss:$24 sps:$4 sm:$0xff]  }
 0x14f   :  { %4029 = vmatpush1.bf16.msra.mxu1 %v6042_v27  ;;  %v6811_v37 = vpop.f32.mrf.mxu1  ;;  %v6120_v26 = vld [vmem:[#allocation6 + $0x1e0] ss:$24 sps:$4 sm:$0xff]  }
 0x150   :  { %v1925_v52 = vpop.f32.mrf.mxu0  ;;  %4030 = vmatprep.subr.bf16.mxu1 %v6050_v28  ;;  %v6815_v27 = vld [vmem:[#allocation4] sm:$0x3f]  ;;  %v6125_v28 = vld [vmem:[#allocation6 + $0x1b4] ss:$24 sps:$4 sm:$0xff]  }
 0x151   :  { %2218 = vmatpush1.bf16.msra.mxu0 %v6036_v29  ;;  %v1966_v40 = vpop.f32.mrf.mxu1  ;;  %v398_v29 = vsub.s32 0, %v6813_v23  ;;  %v6128_v52 = vld [vmem:[#allocation6 + $0x184] ss:$24 sps:$4 sm:$0xff]  }
 0x152   :  { %v1926_v39 = vpop.f32.mrf.mxu0  ;;  %2219 = vmatprep.subr.bf16.mxu0 %v6041_v31  ;;  %v6111_v31 = vld [vmem:[#allocation2 + $0x7c0] ss:$24 sps:$4 sm:$0xff]  }
 0x153   :  { %4031 = vmatpush1.bf16.msra.mxu1 %v6048_v32  ;;  %v1967_v8 = vpop.f32.mrf.mxu1  ;;  %v402_v32 = vsub.s32 1, %v6813_v23  ;;  %v6131_v40 = vld [vmem:[#allocation6 + $0x454] ss:$24 sps:$4 sm:$0xff]  }
 0x154   :  { %4032 = vmatprep.subr.bf16.mxu1 %v6056_v35  ;;  %v6119_v35 = vld [vmem:[#allocation2 + $0x794] ss:$24 sps:$4 sm:$0xff]  }
 0x155   :  { %2220 = vmatpush1.bf16.msra.mxu0 %v6039_v36  ;;  %v6123_v36 = vld [vmem:[#allocation6 + $0x1b0] ss:$24 sps:$4 sm:$0xff]   ;;  %v403_v39 = vrot.slane %v6815_v27, %v402_v32 }
 0x156   :  { %2221 = vmatprep.subr.bf16.mxu0 %v6047_v5  ;;  %v399_v5 = vrot.slane %v6815_v27, %v398_v29  ;;  %v6129_v8 = vld [vmem:[#allocation6 + $0x450] ss:$24 sps:$4 sm:$0xff]  }
 0x157   :  { %4033 = vmatpush1.bf16.msra.mxu1 %v6054_v38  ;;  %v6117_v38 = vld [vmem:[#allocation2 + $0x790] ss:$24 sps:$4 sm:$0xff]  }
 0x158   :  { %4034 = vmatprep.subr.bf16.mxu1 %v6062_v34  ;;  %v6126_v34 = vld [vmem:[#allocation6 + $0x180] ss:$24 sps:$4 sm:$0xff]  }
 0x159   :  { %2222 = vmatpush1.bf16.msra.mxu0 %v6045_v41  ;;  %v1922_v41 = vadd.f32 %v6802_v30, %v399_v5  ;;  %v6267_v5 = vld [vmem:[#allocation6 + $0x600] ss:$24 sps:$4 sm:$0xff]  }
 0x15a   :  { %2223 = vmatprep.subr.bf16.mxu0 %v6053_v42  ;;  %v1924_v42 = vadd.f32 %v6806_v48, %v403_v39  ;;  %v6162_v39 = vld [vmem:[#allocation6 + $0x540] ss:$24 sps:$4 sm:$0xff]  }
 0x15b   :  { %4035 = vmatpush1.bf16.msra.mxu1 %v6060_v43  ;;  %v6134_v43 = vld [vmem:[#allocation6 + $0x424] ss:$24 sps:$4 sm:$0xff]  }
 0x15c   :  { %4036 = vmatprep.subr.bf16.mxu1 %v6068_v44  ;;  %v1963_v44 = vadd.f32 %v6808_v33, %v1922_v41  ;;  %v6281_v41 = vld [vmem:[#allocation6 + $0x8a4] ss:$24 sps:$4 sm:$0xff]  }
 0x15d   :  { %2224 = vmatpush1.bf16.msra.mxu0 %v6051_v45  ;;  %v6132_v45 = vld [vmem:[#allocation6 + $0x420] ss:$24 sps:$4 sm:$0xff]  }
 0x15e   :  { %2225 = vmatprep.subr.bf16.mxu0 %v6059_v46 }
 0x15f   :  { %4037 = vmatpush1.bf16.msra.mxu1 %v6066_v47  ;;  %v1965_v47 = vadd.f32 %v6811_v37, %v1924_v42  ;;  %v6165_v42 = vld [vmem:[#allocation6 + $0x510] ss:$24 sps:$4 sm:$0xff]  }
 0x160   :  { %4038 = vmatprep.subr.bf16.mxu1 %v6074_v49 }
 0x161   :  { %2226 = vmatpush1.bf16.msra.mxu0 %v6057_v50  ;;  %v6137_v50 = vld [vmem:[#allocation6 + $0x3f4] ss:$24 sps:$4 sm:$0xff]  }
 0x162   :  { %2227 = vmatprep.subr.bf16.mxu0 %v6065_v51 }
 0x163   :  { %4039 = vmatpush1.bf16.msra.mxu1 %v6072_v53  ;;  %v6135_v53 = vld [vmem:[#allocation6 + $0x3f0] ss:$24 sps:$4 sm:$0xff]  }
 0x164   :  { %4040 = vmatprep.subr.bf16.mxu1 %v6080_v54 }
 0x165   :  { %2228 = vmatpush1.bf16.msra.mxu0 %v6063_v55 }
 0x166   :  { %2229 = vmatprep.subr.bf16.mxu0 %v6071_v56 }
 0x167   :  { %4041 = vmatpush1.bf16.msra.mxu1 %v6078_v57 }
 0x168   :  { %4042 = vmatprep.subr.bf16.mxu1 %v6086_v58 }
 0x169   :  { %2230 = vmatpush1.bf16.msra.mxu0 %v6069_v59  ;;  %v6138_v59 = vld [vmem:[#allocation6 + $0x3c0] ss:$24 sps:$4 sm:$0xff]  }
 0x16a   :  { %2231 = vmatprep.subr.bf16.mxu0 %v6077_v60 }
 0x16b   :  { %4043 = vmatpush1.bf16.msra.mxu1 %v6084_v61 }
 0x16c   :  { %4044 = vmatprep.subr.bf16.mxu1 %v6092_v62  ;;  %v6227_v62 = vld [vmem:[#allocation6 + $0x754] ss:$24 sps:$4 sm:$0xff]  }
 0x16d   :  { %2232 = vmatpush2.bf16.msra.mxu0 %v6075_v63  ;;  %v6225_v63 = vld [vmem:[#allocation6 + $0x750] ss:$24 sps:$4 sm:$0xff]  }
 0x16e   :  { %2233 = vmatprep.subr.bf16.mxu0 %v6083_v0  ;;  %v6143_v0 = vld [vmem:[#allocation6 + $0x394] ss:$24 sps:$4 sm:$0xff]  }
 0x16f   :  { %4045 = vmatpush2.bf16.msra.mxu1 %v6090_v1  ;;  %v6233_v1 = vld [vmem:[#allocation6 + $0x724] ss:$24 sps:$4 sm:$0xff]  }
 0x170   :  { %4046 = vmatprep.subr.bf16.mxu1 %v6098_v2  ;;  %v6141_v2 = vld [vmem:[#allocation6 + $0x390] ss:$24 sps:$4 sm:$0xff]  }
 0x171   :  { %2234 = vmatpush2.bf16.msra.mxu0 %v6081_v3  ;;  %v6146_v3 = vld [vmem:[#allocation6 + $0x364] ss:$24 sps:$4 sm:$0xff]  }
 0x172   :  { %2235 = vmatprep.subr.bf16.mxu0 %v6089_v4  ;;  %v6231_v4 = vld [vmem:[#allocation6 + $0x720] ss:$24 sps:$4 sm:$0xff]  }
 0x173   :  { %4047 = vmatpush2.bf16.msra.mxu1 %v6096_v6  ;;  %v6239_v6 = vld [vmem:[#allocation6 + $0x6f4] ss:$24 sps:$4 sm:$0xff]  }
 0x174   :  { %4048 = vmatprep.subr.bf16.mxu1 %v6104_v7  ;;  %v6144_v7 = vld [vmem:[#allocation6 + $0x360] ss:$24 sps:$4 sm:$0xff]  }
 0x175   :  { %2236 = vmatpush2.bf16.msra.mxu0 %v6087_v9  ;;  %v6149_v9 = vld [vmem:[#allocation6 + $0x334] ss:$24 sps:$4 sm:$0xff]  }
 0x176   :  { %2237 = vmatprep.subr.bf16.mxu0 %v6095_v10  ;;  %v6237_v10 = vld [vmem:[#allocation6 + $0x6f0] ss:$24 sps:$4 sm:$0xff]  }
 0x177   :  { %4049 = vmatpush2.bf16.msra.mxu1 %v6102_v11  ;;  %v6245_v11 = vld [vmem:[#allocation6 + $0x6c4] ss:$24 sps:$4 sm:$0xff]  }
 0x178   :  { %4050 = vmatprep.subr.bf16.mxu1 %v6110_v12  ;;  %v6147_v12 = vld [vmem:[#allocation6 + $0x330] ss:$24 sps:$4 sm:$0xff]  }
 0x179   :  { %2238 = vmatpush2.bf16.msra.mxu0 %v6093_v14  ;;  %v6152_v14 = vld [vmem:[#allocation6 + $0x304] ss:$24 sps:$4 sm:$0xff]  }
 0x17a   :  { %2239 = vmatprep.subr.bf16.mxu0 %v6101_v15  ;;  %v6243_v15 = vld [vmem:[#allocation6 + $0x6c0] ss:$24 sps:$4 sm:$0xff]  }
 0x17b   :  { %4051 = vmatpush2.bf16.msra.mxu1 %v6108_v16  ;;  %v6251_v16 = vld [vmem:[#allocation6 + $0x694] ss:$24 sps:$4 sm:$0xff]  }
 0x17c   :  { %4052 = vmatprep.subr.bf16.mxu1 %v6116_v17  ;;  %v6150_v17 = vld [vmem:[#allocation6 + $0x300] ss:$24 sps:$4 sm:$0xff]  }
 0x17d   :  { %2240 = vmatpush2.bf16.msra.mxu0 %v6099_v19  ;;  %v6249_v19 = vld [vmem:[#allocation6 + $0x690] ss:$24 sps:$4 sm:$0xff]  }
 0x17e   :  { %2241 = vmatprep.subr.bf16.mxu0 %v6107_v20  ;;  %v6257_v20 = vld [vmem:[#allocation6 + $0x664] ss:$24 sps:$4 sm:$0xff]  }
 0x17f   :  { %4053 = vmatpush2.bf16.msra.mxu1 %v6114_v21  ;;  %v6153_v21 = vld [vmem:[#allocation6 + $0x5d0] ss:$24 sps:$4 sm:$0xff]  }
 0x180   :  { %4054 = vmatprep.subr.bf16.mxu1 %v6122_v22  ;;  %v6158_v22 = vld [vmem:[#allocation6 + $0x5a4] ss:$24 sps:$4 sm:$0xff]  }
 0x181   :  { %2242 = vmatpush2.bf16.msra.mxu0 %v6105_v24  ;;  %v6255_v24 = vld [vmem:[#allocation6 + $0x660] ss:$24 sps:$4 sm:$0xff]  }
 0x182   :  { %2243 = vmatprep.subr.bf16.mxu0 %v6113_v25  ;;  %v6263_v25 = vld [vmem:[#allocation6 + $0x634] ss:$24 sps:$4 sm:$0xff]  }
 0x183   :  { %4055 = vmatpush2.bf16.msra.mxu1 %v6120_v26  ;;  %v6156_v26 = vld [vmem:[#allocation6 + $0x5a0] ss:$24 sps:$4 sm:$0xff]  }
 0x184   :  { %4056 = vmatprep.subr.bf16.mxu1 %v6125_v28  ;;  %v6161_v28 = vld [vmem:[#allocation6 + $0x574] ss:$24 sps:$4 sm:$0xff]  }
 0x185   :  { %2244 = vmatpush2.bf16.msra.mxu0 %v6111_v31  ;;  %v6261_v31 = vld [vmem:[#allocation6 + $0x630] ss:$24 sps:$4 sm:$0xff]  }
 0x186   :  { %2245 = vmatprep.subr.bf16.mxu0 %v6119_v35  ;;  %v6269_v35 = vld [vmem:[#allocation6 + $0x604] ss:$24 sps:$4 sm:$0xff]  }
 0x187   :  { %4057 = vmatpush2.bf16.msra.mxu1 %v6123_v36  ;;  %v6159_v36 = vld [vmem:[#allocation6 + $0x570] ss:$24 sps:$4 sm:$0xff]  }
 0x188   :  { %4058 = vmatprep.subr.bf16.mxu1 %v6128_v52  ;;  %v6164_v52 = vld [vmem:[#allocation6 + $0x544] ss:$24 sps:$4 sm:$0xff]  }
 0x189   :  { %2246 = vmatpush2.bf16.msra.mxu0 %v6117_v38  ;;  %v6275_v38 = vld [vmem:[#allocation6 + $0x8d4] ss:$24 sps:$4 sm:$0xff]  }
 0x18a   :  { %4069 = vmatprep.subr.bf16.mxu0 %v6131_v40  ;;  %v6273_v40 = vld [vmem:[#allocation6 + $0x8d0] ss:$24 sps:$4 sm:$0xff]  }
 0x18b   :  { %4059 = vmatpush2.bf16.msra.mxu1 %v6126_v34  ;;  %v6167_v34 = vld [vmem:[#allocation6 + $0x514] ss:$24 sps:$4 sm:$0xff]  }
 0x18c   :  { %v2003_v46 = vpop.f32.mrf.mxu0  ;;  %2248 = vmatmul.mubr.bf16.vlgmr.msra.gmra.mxu0 %v6792_v13  ;;  %v6140_v13 = vld [vmem:[#allocation6 + $0x3c4] ss:$24 sps:$4 sm:$0xff]   ;;  %4110 = vmatprep.subr.bf16.mxu1 %v6227_v62 }
 0x18d   :  { %v2004_v49 = vadd.f32 %v2003_v46, %v1963_v44  ;;  %4070 = vmatpush1.bf16.msra.mxu0 %v6129_v8  ;;  %v6279_v8 = vld [vmem:[#allocation6 + $0x8a0] ss:$24 sps:$4 sm:$0xff]   ;;  %v6287_v44 = vld [vmem:[#allocation6 + $0x874] ss:$24 sps:$4 sm:$0xff]   ;;  %v6285_v46 = vld [vmem:[#allocation6 + $0x870] ss:$24 sps:$4 sm:$0xff]  }
 0x18e   :  { %v2005_v30 = vpop.f32.mrf.mxu0  ;;  %4071 = vmatprep.subr.bf16.mxu0 %v6134_v43  ;;  %v6830_v51 = vpop.f32.mrf.mxu1  ;;  %v6170_v43 = vld [vmem:[#allocation6 + $0x4e4] ss:$24 sps:$4 sm:$0xff]  }
 0x18f   :  { %v2006_v48 = vadd.f32 %v2005_v30, %v1965_v47  ;;  %v2256_v54 = vmax.f32 %v2004_v49, 0.0  ;;  %v6173_v47 = vld [vmem:[#allocation6 + $0x4b4] ss:$24 sps:$4 sm:$0xff]   ;;  %v6293_v49 = vld [vmem:[#allocation6 + $0x844] ss:$24 sps:$4 sm:$0xff]   ;;  %v406_v30 = vsub.s32 2, %v6813_v23 }
 0x190   :  { %v2007_v55 = vpop.f32.mrf.mxu0  ;;  %v6832_v56 = vpop.f32.mrf.mxu1 }
 0x191   :  { %v2257_v33 = vmax.f32 %v2006_v48, 0.0  ;;  %4072 = vmatpush1.bf16.msra.mxu0 %v6132_v45  ;;  %v6836_v60 = vpack.c.bf16 %v2256_v54, %v2256_v54  ;;  %v6168_v45 = vld [vmem:[#allocation6 + $0x4e0] ss:$24 sps:$4 sm:$0xff]   ;;  %v410_v54 = vsub.s32 3, %v6813_v23  ;;  %v6299_v55 = vld [vmem:[#allocation6 + $0x814] ss:$24 sps:$4 sm:$0xff]  }
 0x192   :  { %v2008_v57 = vpop.f32.mrf.mxu0  ;;  %4073 = vmatprep.subr.bf16.mxu0 %v6137_v50  ;;  %v2048_v58 = vpop.f32.mrf.mxu1  ;;  %v6171_v50 = vld [vmem:[#allocation6 + $0x4b0] ss:$24 sps:$4 sm:$0xff]   ;;  %v6291_v48 = vld [vmem:[#allocation6 + $0x840] ss:$24 sps:$4 sm:$0xff]  }
 0x193   :  { %v6834_v37 = vpack.c.bf16 %v2257_v33, %v2257_v33  ;;  %v407_v33 = vrot.slane %v6815_v27, %v406_v30  ;;  %v6174_v57 = vld [vmem:[#allocation6 + $0x480] ss:$24 sps:$4 sm:$0xff]   ;;  %v6179_v58 = vld [vmem:[#allocation6 + $0x15c] ss:$24 sps:$4 sm:$0xff]  }
 0x194   :  { %v2049_v61 = vpop.f32.mrf.mxu1 }
 0x195   :  { %4060 = vmatprep.mubr.bf16.mxu1 %v6834_v37  ;;  %4074 = vmatpush1.bf16.msra.mxu0 %v6135_v53  ;;  %v6176_v53 = vld [vmem:[#allocation6 + $0x484] ss:$24 sps:$4 sm:$0xff]   ;;  %v2045_v62 = vadd.f32 %v6830_v51, %v407_v33  ;;  %v6216_v33 = vld [vmem:[#allocation6 + $0x1e8] ss:$24 sps:$4 sm:$0xff]  }
 0x196   :  { %4061 = vmatmul.mubr.bf16.vlgmr.msra.gmra.mxu1 %v6836_v60  ;;  %4075 = vmatprep.subr.bf16.mxu0 %v6140_v13  ;;  %v6297_v13 = vld [vmem:[#allocation6 + $0x810] ss:$24 sps:$4 sm:$0xff]   ;;  %v6305_v61 = vld [vmem:[#allocation6 + $0x7e4] ss:$24 sps:$4 sm:$0xff]  }
 0x197   :  { %4111 = vmatpush1.bf16.msra.mxu1 %v6225_v63  ;;  %v6303_v63 = vld [vmem:[#allocation6 + $0x7e0] ss:$24 sps:$4 sm:$0xff]   ;;  %v6317_v51 = vld [vmem:[#allocation6 + $0x784] ss:$24 sps:$4 sm:$0xff]  }
 0x198   :  { %4112 = vmatprep.subr.bf16.mxu1 %v6233_v1 }
 0x199   :  { %4076 = vmatpush1.bf16.msra.mxu0 %v6138_v59  ;;  %v411_v59 = vrot.slane %v6815_v27, %v410_v54 }
 0x19a   :  { %4077 = vmatprep.subr.bf16.mxu0 %v6143_v0 }
 0x19b   :  { %4113 = vmatpush1.bf16.msra.mxu1 %v6231_v4  ;;  %v2047_v0 = vadd.f32 %v6832_v56, %v411_v59  ;;  %v6309_v4 = vld [vmem:[#allocation6 + $0x7b0] ss:$24 sps:$4 sm:$0xff]  }
 0x19c   :  { %4114 = vmatprep.subr.bf16.mxu1 %v6239_v6 }
 0x19d   :  { %4078 = vmatpush1.bf16.msra.mxu0 %v6141_v2  ;;  %v6311_v2 = vld [vmem:[#allocation6 + $0x7b4] ss:$24 sps:$4 sm:$0xff]  }
 0x19e   :  { %4079 = vmatprep.subr.bf16.mxu0 %v6146_v3 }
 0x19f   :  { %4115 = vmatpush1.bf16.msra.mxu1 %v6237_v10 }
 0x1a0   :  { %4116 = vmatprep.subr.bf16.mxu1 %v6245_v11 }
 0x1a1   :  { %4080 = vmatpush1.bf16.msra.mxu0 %v6144_v7 }
 0x1a2   :  { %4081 = vmatprep.subr.bf16.mxu0 %v6149_v9 }
 0x1a3   :  { %4117 = vmatpush1.bf16.msra.mxu1 %v6243_v15  ;;  %v6315_v15 = vld [vmem:[#allocation6 + $0x780] ss:$24 sps:$4 sm:$0xff]  }
 0x1a4   :  { %4118 = vmatprep.subr.bf16.mxu1 %v6251_v16 }
 0x1a5   :  { %4082 = vmatpush1.bf16.msra.mxu0 %v6147_v12 }
 0x1a6   :  { %4083 = vmatprep.subr.bf16.mxu0 %v6152_v14 }
 0x1a7   :  { %4119 = vmatpush1.bf16.msra.mxu1 %v6249_v19 }
 0x1a8   :  { %4120 = vmatprep.subr.bf16.mxu1 %v6257_v20  ;;  %v6323_v20 = vld [vmem:[#allocation6 + $0x45c] ss:$24 sps:$4 sm:$0xff]  }
 0x1a9   :  { %4084 = vmatpush1.bf16.msra.mxu0 %v6150_v17 }
 0x1aa   :  { %4085 = vmatprep.subr.bf16.mxu0 %v6155_v18 }
 0x1ab   :  { %4121 = vmatpush1.bf16.msra.mxu1 %v6255_v24 }
 0x1ac   :  { %4122 = vmatprep.subr.bf16.mxu1 %v6263_v25  ;;  %v6182_v25 = vld [vmem:[#allocation6 + $0x12c] ss:$24 sps:$4 sm:$0xff]  }
 0x1ad   :  { %4086 = vmatpush2.bf16.msra.mxu0 %v6153_v21 }
 0x1ae   :  { %4087 = vmatprep.subr.bf16.mxu0 %v6158_v22  ;;  %v6177_v22 = vld [vmem:[#allocation6 + $0x158] ss:$24 sps:$4 sm:$0xff]  }
 0x1af   :  { %4123 = vmatpush1.bf16.msra.mxu1 %v6261_v31  ;;  %v6183_v31 = vld [vmem:[#allocation6 + $0xf8] ss:$24 sps:$4 sm:$0xff]  }
 0x1b0   :  { %4124 = vmatprep.subr.bf16.mxu1 %v6269_v35  ;;  %v6188_v35 = vld [vmem:[#allocation6 + $0xcc] ss:$24 sps:$4 sm:$0xff]  }
 0x1b1   :  { %4088 = vmatpush2.bf16.msra.mxu0 %v6156_v26  ;;  %v6180_v26 = vld [vmem:[#allocation6 + $0x128] ss:$24 sps:$4 sm:$0xff]  }
 0x1b2   :  { %4089 = vmatprep.subr.bf16.mxu0 %v6161_v28  ;;  %v6185_v28 = vld [vmem:[#allocation6 + $0xfc] ss:$24 sps:$4 sm:$0xff]  }
 0x1b3   :  { %4125 = vmatpush1.bf16.msra.mxu1 %v6267_v5  ;;  %v6189_v5 = vld [vmem:[#allocation6 + $0x98] ss:$24 sps:$4 sm:$0xff]  }
 0x1b4   :  { %4126 = vmatprep.subr.bf16.mxu1 %v6275_v38  ;;  %v6194_v38 = vld [vmem:[#allocation6 + $0x6c] ss:$24 sps:$4 sm:$0xff]  }
 0x1b5   :  { %4090 = vmatpush2.bf16.msra.mxu0 %v6159_v36  ;;  %v6186_v36 = vld [vmem:[#allocation6 + $0xc8] ss:$24 sps:$4 sm:$0xff]  }
 0x1b6   :  { %4091 = vmatprep.subr.bf16.mxu0 %v6164_v52  ;;  %v6191_v52 = vld [vmem:[#allocation6 + $0x9c] ss:$24 sps:$4 sm:$0xff]  }
 0x1b7   :  { %4127 = vmatpush2.bf16.msra.mxu1 %v6273_v40  ;;  %v6195_v40 = vld [vmem:[#allocation6 + $0x38] ss:$24 sps:$4 sm:$0xff]  }
 0x1b8   :  { %4128 = vmatprep.subr.bf16.mxu1 %v6281_v41  ;;  %v6200_v41 = vld [vmem:[#allocation6 + $0xc] ss:$24 sps:$4 sm:$0xff]  }
 0x1b9   :  { %4092 = vmatpush2.bf16.msra.mxu0 %v6162_v39  ;;  %v6192_v39 = vld [vmem:[#allocation6 + $0x68] ss:$24 sps:$4 sm:$0xff]  }
 0x1ba   :  { %4093 = vmatprep.subr.bf16.mxu0 %v6167_v34  ;;  %v6197_v34 = vld [vmem:[#allocation6 + $0x3c] ss:$24 sps:$4 sm:$0xff]  }
 0x1bb   :  { %4129 = vmatpush2.bf16.msra.mxu1 %v6279_v8  ;;  %v6203_v8 = vld [vmem:[#allocation6 + $0x2dc] ss:$24 sps:$4 sm:$0xff]  }
 0x1bc   :  { %4130 = vmatprep.subr.bf16.mxu1 %v6287_v44  ;;  %v6206_v44 = vld [vmem:[#allocation6 + $0x2ac] ss:$24 sps:$4 sm:$0xff]  }
 0x1bd   :  { %4094 = vmatpush2.bf16.msra.mxu0 %v6165_v42  ;;  %v6198_v42 = vld [vmem:[#allocation6 + $0x8] ss:$24 sps:$4 sm:$0xff]  }
 0x1be   :  { %4095 = vmatprep.subr.bf16.mxu0 %v6170_v43  ;;  %v6201_v43 = vld [vmem:[#allocation6 + $0x2d8] ss:$24 sps:$4 sm:$0xff]  }
 0x1bf   :  { %4131 = vmatpush2.bf16.msra.mxu1 %v6285_v46  ;;  %v6209_v46 = vld [vmem:[#allocation6 + $0x27c] ss:$24 sps:$4 sm:$0xff]  }
 0x1c0   :  { %4132 = vmatprep.subr.bf16.mxu1 %v6293_v49  ;;  %v6212_v49 = vld [vmem:[#allocation6 + $0x24c] ss:$24 sps:$4 sm:$0xff]  }
 0x1c1   :  { %4096 = vmatpush2.bf16.msra.mxu0 %v6168_v45  ;;  %v6204_v45 = vld [vmem:[#allocation6 + $0x2a8] ss:$24 sps:$4 sm:$0xff]  }
 0x1c2   :  { %4097 = vmatprep.subr.bf16.mxu0 %v6173_v47  ;;  %v6207_v47 = vld [vmem:[#allocation6 + $0x278] ss:$24 sps:$4 sm:$0xff]  }
 0x1c3   :  { %4133 = vmatpush2.bf16.msra.mxu1 %v6291_v48  ;;  %v6215_v48 = vld [vmem:[#allocation6 + $0x21c] ss:$24 sps:$4 sm:$0xff]  }
 0x1c4   :  { %4134 = vmatprep.subr.bf16.mxu1 %v6299_v55  ;;  %v6218_v55 = vld [vmem:[#allocation6 + $0x1ec] ss:$24 sps:$4 sm:$0xff]  }
 0x1c5   :  { %4098 = vmatpush2.bf16.msra.mxu0 %v6171_v50  ;;  %v6210_v50 = vld [vmem:[#allocation6 + $0x248] ss:$24 sps:$4 sm:$0xff]  }
 0x1c6   :  { %4099 = vmatprep.subr.bf16.mxu0 %v6176_v53  ;;  %v6213_v53 = vld [vmem:[#allocation6 + $0x218] ss:$24 sps:$4 sm:$0xff]  }
 0x1c7   :  { %4135 = vmatpush2.bf16.msra.mxu1 %v6297_v13 }
 0x1c8   :  { %4136 = vmatprep.subr.bf16.mxu1 %v6305_v61 }
 0x1c9   :  { %4100 = vmatpush2.bf16.msra.mxu0 %v6174_v57  ;;  %v6221_v57 = vld [vmem:[#allocation6 + $0x1bc] ss:$24 sps:$4 sm:$0xff]  }
 0x1ca   :  { %4151 = vmatprep.subr.bf16.mxu0 %v6179_v58  ;;  %v6219_v58 = vld [vmem:[#allocation6 + $0x1b8] ss:$24 sps:$4 sm:$0xff]  }
 0x1cb   :  { %4137 = vmatpush2.bf16.msra.mxu1 %v6303_v63 }
 0x1cc   :  { %v2085_v1 = vpop.f32.mrf.mxu0  ;;  %4138 = vmatprep.subr.bf16.mxu1 %v6311_v2 }
 0x1cd   :  { %v2086_v3 = vadd.f32 %v2085_v1, %v2045_v62  ;;  %v6224_v62 = vld [vmem:[#allocation6 + $0x18c] ss:$24 sps:$4 sm:$0xff]   ;;  %v6222_v1 = vld [vmem:[#allocation6 + $0x188] ss:$24 sps:$4 sm:$0xff]  }
 0x1ce   :  { %v2087_v6 = vpop.f32.mrf.mxu0  ;;  %v2126_v7 = vpop.f32.mrf.mxu1 }
 0x1cf   :  { %v2088_v9 = vadd.f32 %v2087_v6, %v2047_v0  ;;  %v2127_v10 = vadd.f32 %v2126_v7, %v2086_v3  ;;  %4139 = vmatpush2.bf16.msra.mxu1 %v6309_v4  ;;  %v6230_v3 = vld [vmem:[#allocation6 + $0x75c] ss:$24 sps:$4 sm:$0xff]   ;;  %v6228_v7 = vld [vmem:[#allocation6 + $0x758] ss:$24 sps:$4 sm:$0xff]  }
 0x1d0   :  { %v2089_v11 = vpop.f32.mrf.mxu0  ;;  %v2128_v12 = vpop.f32.mrf.mxu1  ;;  %4140 = vmatprep.subr.bf16.mxu1 %v6317_v51  ;;  %v6248_v51 = vld [vmem:[#allocation6 + $0x6cc] ss:$24 sps:$4 sm:$0xff]  }
 0x1d1   :  { %v2129_v14 = vadd.f32 %v2128_v12, %v2088_v9  ;;  %v2258_v16 = vmax.f32 %v2127_v10, 0.0  ;;  %v6236_v9 = vld [vmem:[#allocation6 + $0x72c] ss:$24 sps:$4 sm:$0xff]   ;;  %v6234_v10 = vld [vmem:[#allocation6 + $0x728] ss:$24 sps:$4 sm:$0xff]  }
 0x1d2   :  { %v2090_v17 = vpop.f32.mrf.mxu0  ;;  %v2130_v18 = vpop.f32.mrf.mxu1  ;;  %v6242_v11 = vld [vmem:[#allocation6 + $0x6fc] ss:$24 sps:$4 sm:$0xff]   ;;  %v6240_v12 = vld [vmem:[#allocation6 + $0x6f8] ss:$24 sps:$4 sm:$0xff]  }
 0x1d3   :  { %v2259_v56 = vmax.f32 %v2129_v14, 0.0  ;;  %4141 = vmatpush2.bf16.msra.mxu1 %v6315_v15  ;;  %v6852_v24 = vpack.c.bf16 %v2258_v16, %v2258_v16  ;;  %v6246_v14 = vld [vmem:[#allocation6 + $0x6c8] ss:$24 sps:$4 sm:$0xff]   ;;  %v6254_v15 = vld [vmem:[#allocation6 + $0x69c] ss:$24 sps:$4 sm:$0xff]  }
 0x1d4   :  { %v2131_v19 = vpop.f32.mrf.mxu1  ;;  %4192 = vmatprep.subr.bf16.mxu1 %v6323_v20  ;;  %v6252_v16 = vld [vmem:[#allocation6 + $0x698] ss:$24 sps:$4 sm:$0xff]   ;;  %v6260_v17 = vld [vmem:[#allocation6 + $0x66c] ss:$24 sps:$4 sm:$0xff]   ;;  %v6258_v18 = vld [vmem:[#allocation6 + $0x668] ss:$24 sps:$4 sm:$0xff]  }
 0x1d5   :  { %v6850_v21 = vpack.c.bf16 %v2259_v56, %v2259_v56  ;;  %v6266_v56 = vld [vmem:[#allocation6 + $0x63c] ss:$24 sps:$4 sm:$0xff]   ;;  %v6264_v19 = vld [vmem:[#allocation6 + $0x638] ss:$24 sps:$4 sm:$0xff]   ;;  %v6272_v20 = vld [vmem:[#allocation6 + $0x60c] ss:$24 sps:$4 sm:$0xff]  }
 0x1d7   :  { %4101 = vmatprep.mubr.bf16.mxu0 %v6850_v21 }
 0x1d8   :  { %4102 = vmatmul.mubr.bf16.vlgmr.msra.gmra.mxu0 %v6852_v24 }
 0x1d9   :  { %4152 = vmatpush1.bf16.msra.mxu0 %v6177_v22  ;;  %4183 = vmatprep.mubr.bf16.mxu0 %v6834_v37  ;;  %v6270_v22 = vld [vmem:[#allocation6 + $0x608] ss:$24 sps:$4 sm:$0xff]  }
 0x1da   :  { %4153 = vmatprep.subr.bf16.mxu0 %v6182_v25  ;;  %v6278_v25 = vld [vmem:[#allocation6 + $0x8dc] ss:$24 sps:$4 sm:$0xff]  }
 0x1dd   :  { %4154 = vmatpush1.bf16.msra.mxu0 %v6180_v26  ;;  %v6276_v26 = vld [vmem:[#allocation6 + $0x8d8] ss:$24 sps:$4 sm:$0xff]  }
 0x1de   :  { %4155 = vmatprep.subr.bf16.mxu0 %v6185_v28  ;;  %v6284_v28 = vld [vmem:[#allocation6 + $0x8ac] ss:$24 sps:$4 sm:$0xff]  }
 0x1e1   :  { %4156 = vmatpush1.bf16.msra.mxu0 %v6183_v31  ;;  %v6282_v31 = vld [vmem:[#allocation6 + $0x8a8] ss:$24 sps:$4 sm:$0xff]  }
 0x1e2   :  { %4157 = vmatprep.subr.bf16.mxu0 %v6188_v35  ;;  %v6290_v35 = vld [vmem:[#allocation6 + $0x87c] ss:$24 sps:$4 sm:$0xff]  }
 0x1e5   :  { %4158 = vmatpush1.bf16.msra.mxu0 %v6186_v36  ;;  %v6288_v36 = vld [vmem:[#allocation6 + $0x878] ss:$24 sps:$4 sm:$0xff]  }
 0x1e6   :  { %4159 = vmatprep.subr.bf16.mxu0 %v6191_v52  ;;  %v6296_v52 = vld [vmem:[#allocation6 + $0x84c] ss:$24 sps:$4 sm:$0xff]  }
 0x1e9   :  { %4160 = vmatpush1.bf16.msra.mxu0 %v6189_v5  ;;  %v414_v5 = vsub.s32 4, %v6813_v23 }
 0x1ea   :  { %4161 = vmatprep.subr.bf16.mxu0 %v6194_v38  ;;  %v418_v38 = vsub.s32 5, %v6813_v23 }
 0x1ed   :  { %4162 = vmatpush1.bf16.msra.mxu0 %v6192_v39  ;;  %v6294_v39 = vld [vmem:[#allocation6 + $0x848] ss:$24 sps:$4 sm:$0xff]  }
 0x1ee   :  { %4163 = vmatprep.subr.bf16.mxu0 %v6197_v34  ;;  %v6302_v34 = vld [vmem:[#allocation6 + $0x81c] ss:$24 sps:$4 sm:$0xff]  }
 0x1f1   :  { %4164 = vmatpush1.bf16.msra.mxu0 %v6195_v40  ;;  %v415_v40 = vrot.slane %v6815_v27, %v414_v5 }
 0x1f2   :  { %4165 = vmatprep.subr.bf16.mxu0 %v6200_v41  ;;  %v419_v41 = vrot.slane %v6815_v27, %v418_v38  ;;  %v6312_v27 = vld [vmem:[#allocation6 + $0x7b8] ss:$24 sps:$4 sm:$0xff]  }
 0x1f5   :  { %4166 = vmatpush1.bf16.msra.mxu0 %v6198_v42  ;;  %v6300_v42 = vld [vmem:[#allocation6 + $0x818] ss:$24 sps:$4 sm:$0xff]  }
 0x1f6   :  { %4167 = vmatprep.subr.bf16.mxu0 %v6203_v8  ;;  %v6308_v8 = vld [vmem:[#allocation6 + $0x7ec] ss:$24 sps:$4 sm:$0xff]  }
 0x1f9   :  { %4168 = vmatpush2.bf16.msra.mxu0 %v6201_v43 }
 0x1fa   :  { %4169 = vmatprep.subr.bf16.mxu0 %v6206_v44 }
 0x1fd   :  { %4170 = vmatpush2.bf16.msra.mxu0 %v6204_v45  ;;  %v6306_v45 = vld [vmem:[#allocation6 + $0x7e8] ss:$24 sps:$4 sm:$0xff]  }
 0x1fe   :  { %4171 = vmatprep.subr.bf16.mxu0 %v6209_v46  ;;  %v6314_v46 = vld [vmem:[#allocation6 + $0x7bc] ss:$24 sps:$4 sm:$0xff]  }
 0x201   :  { %4172 = vmatpush2.bf16.msra.mxu0 %v6207_v47 }
 0x202   :  { %4173 = vmatprep.subr.bf16.mxu0 %v6212_v49 }
 0x205   :  { %4174 = vmatpush2.bf16.msra.mxu0 %v6210_v50 }
 0x206   :  { %4175 = vmatprep.subr.bf16.mxu0 %v6215_v48 }
 0x209   :  { %4176 = vmatpush2.bf16.msra.mxu0 %v6213_v53 }
 0x20a   :  { %4177 = vmatprep.subr.bf16.mxu0 %v6218_v55  ;;  %v6320_v55 = vld [vmem:[#allocation6 + $0x78c] ss:$24 sps:$4 sm:$0xff]  }
 0x20c   :  { %v6857_v13 = vpop.f32.mrf.mxu0 }
 0x20d   :  { %4178 = vmatpush2.bf16.msra.mxu0 %v6216_v33  ;;  %v2168_v43 = vadd.f32 %v6857_v13, %v415_v40  ;;  %v6360_v40 = vld [vmem:[#allocation6 + $0x340] ss:$24 sps:$4 sm:$0xff]  }
 0x20e   :  { %v6859_v59 = vpop.f32.mrf.mxu0  ;;  %v6861_v61 = vpop.f32.mrf.mxu1  ;;  %4179 = vmatprep.subr.bf16.mxu0 %v6221_v57 }
 0x20f   :  { %v2170_v44 = vadd.f32 %v6859_v59, %v419_v41  ;;  %v2209_v47 = vadd.f32 %v6861_v61, %v2168_v43  ;;  %v6318_v59 = vld [vmem:[#allocation6 + $0x788] ss:$24 sps:$4 sm:$0xff]   ;;  %v6321_v61 = vld [vmem:[#allocation6 + $0x458] ss:$24 sps:$4 sm:$0xff]   ;;  %v6368_v41 = vld [vmem:[#allocation6 + $0x314] ss:$24 sps:$4 sm:$0xff]  }
 0x210   :  { %v2171_v63 = vpop.f32.mrf.mxu0  ;;  %v6863_v0 = vpop.f32.mrf.mxu1  ;;  %v6366_v43 = vld [vmem:[#allocation6 + $0x310] ss:$24 sps:$4 sm:$0xff]  }
 0x211   :  { %4180 = vmatpush2.bf16.msra.mxu0 %v6219_v58  ;;  %v2211_v50 = vadd.f32 %v6863_v0, %v2170_v44  ;;  %v6326_v0 = vld [vmem:[#allocation6 + $0x464] ss:$24 sps:$4 sm:$0xff]  }
 0x212   :  { %v2172_v2 = vpop.f32.mrf.mxu0  ;;  %4181 = vmatprep.subr.bf16.mxu0 %v6224_v62  ;;  %v2212_v4 = vpop.f32.mrf.mxu1  ;;  %v6374_v44 = vld [vmem:[#allocation6 + $0x5e4] ss:$24 sps:$4 sm:$0xff]  }
 0x213   :  { %v6324_v2 = vld [vmem:[#allocation6 + $0x460] ss:$24 sps:$4 sm:$0xff]   ;;  %v6329_v4 = vld [vmem:[#allocation6 + $0x42c] ss:$24 sps:$4 sm:$0xff]  }
 0x214   :  { %v2213_v6 = vpop.f32.mrf.mxu1 }
 0x215   :  { %4182 = vmatpush2.bf16.msra.mxu0 %v6222_v1  ;;  %v6332_v6 = vld [vmem:[#allocation6 + $0x434] ss:$24 sps:$4 sm:$0xff]  }
 0x216   :  { %4233 = vmatprep.subr.bf16.mxu0 %v6230_v3 }
 0x218   :  { %4184 = vmatmul.mubr.bf16.vlgmr.msra.gmra.mxu0 %v6836_v60 }
 0x219   :  { %4234 = vmatpush1.bf16.msra.mxu0 %v6228_v7  ;;  %v6327_v7 = vld [vmem:[#allocation6 + $0x428] ss:$24 sps:$4 sm:$0xff]  }
 0x21a   :  { %4235 = vmatprep.subr.bf16.mxu0 %v6236_v9 }
 0x21d   :  { %4236 = vmatpush1.bf16.msra.mxu0 %v6234_v10  ;;  %v6335_v10 = vld [vmem:[#allocation6 + $0x3fc] ss:$24 sps:$4 sm:$0xff]  }
 0x21e   :  { %4237 = vmatprep.subr.bf16.mxu0 %v6242_v11  ;;  %v6330_v11 = vld [vmem:[#allocation6 + $0x430] ss:$24 sps:$4 sm:$0xff]  }
 0x221   :  { %4238 = vmatpush1.bf16.msra.mxu0 %v6240_v12 }
 0x222   :  { %4239 = vmatprep.subr.bf16.mxu0 %v6248_v51  ;;  %v6338_v51 = vld [vmem:[#allocation6 + $0x404] ss:$24 sps:$4 sm:$0xff]  }
 0x225   :  { %4240 = vmatpush1.bf16.msra.mxu0 %v6246_v14  ;;  %v6333_v14 = vld [vmem:[#allocation6 + $0x3f8] ss:$24 sps:$4 sm:$0xff]  }
 0x226   :  { %4241 = vmatprep.subr.bf16.mxu0 %v6254_v15 }
 0x229   :  { %4242 = vmatpush1.bf16.msra.mxu0 %v6252_v16  ;;  %v6341_v16 = vld [vmem:[#allocation6 + $0x3cc] ss:$24 sps:$4 sm:$0xff]  }
 0x22a   :  { %4243 = vmatprep.subr.bf16.mxu0 %v6260_v17  ;;  %v6336_v17 = vld [vmem:[#allocation6 + $0x400] ss:$24 sps:$4 sm:$0xff]  }
 0x22d   :  { %4244 = vmatpush1.bf16.msra.mxu0 %v6258_v18  ;;  %v6344_v18 = vld [vmem:[#allocation6 + $0x3d4] ss:$24 sps:$4 sm:$0xff]  }
 0x22e   :  { %4245 = vmatprep.subr.bf16.mxu0 %v6266_v56  ;;  %v6339_v56 = vld [vmem:[#allocation6 + $0x3c8] ss:$24 sps:$4 sm:$0xff]  }
 0x231   :  { %4246 = vmatpush1.bf16.msra.mxu0 %v6264_v19  ;;  %v6347_v19 = vld [vmem:[#allocation6 + $0x39c] ss:$24 sps:$4 sm:$0xff]  }
 0x232   :  { %4247 = vmatprep.subr.bf16.mxu0 %v6272_v20  ;;  %v6350_v20 = vld [vmem:[#allocation6 + $0x3a4] ss:$24 sps:$4 sm:$0xff]  }
 0x235   :  { %4248 = vmatpush1.bf16.msra.mxu0 %v6270_v22  ;;  %v6345_v22 = vld [vmem:[#allocation6 + $0x398] ss:$24 sps:$4 sm:$0xff]  }
 0x236   :  { %4249 = vmatprep.subr.bf16.mxu0 %v6278_v25  ;;  %v6353_v25 = vld [vmem:[#allocation6 + $0x36c] ss:$24 sps:$4 sm:$0xff]  }
 0x239   :  { %4250 = vmatpush2.bf16.msra.mxu0 %v6276_v26  ;;  %v6348_v26 = vld [vmem:[#allocation6 + $0x3a0] ss:$24 sps:$4 sm:$0xff]  }
 0x23a   :  { %4251 = vmatprep.subr.bf16.mxu0 %v6284_v28  ;;  %v6356_v28 = vld [vmem:[#allocation6 + $0x374] ss:$24 sps:$4 sm:$0xff]  }
 0x23d   :  { %4252 = vmatpush2.bf16.msra.mxu0 %v6282_v31  ;;  %v6351_v31 = vld [vmem:[#allocation6 + $0x368] ss:$24 sps:$4 sm:$0xff]  }
 0x23e   :  { %4253 = vmatprep.subr.bf16.mxu0 %v6290_v35  ;;  %v6359_v35 = vld [vmem:[#allocation6 + $0x33c] ss:$24 sps:$4 sm:$0xff]  }
 0x241   :  { %4254 = vmatpush2.bf16.msra.mxu0 %v6288_v36  ;;  %v6354_v36 = vld [vmem:[#allocation6 + $0x370] ss:$24 sps:$4 sm:$0xff]  }
 0x242   :  { %4255 = vmatprep.subr.bf16.mxu0 %v6296_v52  ;;  %v6362_v52 = vld [vmem:[#allocation6 + $0x344] ss:$24 sps:$4 sm:$0xff]  }
 0x245   :  { %4256 = vmatpush2.bf16.msra.mxu0 %v6294_v39  ;;  %v6357_v39 = vld [vmem:[#allocation6 + $0x338] ss:$24 sps:$4 sm:$0xff]  }
 0x246   :  { %4257 = vmatprep.subr.bf16.mxu0 %v6302_v34  ;;  %v6365_v34 = vld [vmem:[#allocation6 + $0x30c] ss:$24 sps:$4 sm:$0xff]  }
 0x249   :  { %4258 = vmatpush2.bf16.msra.mxu0 %v6300_v42  ;;  %v6363_v42 = vld [vmem:[#allocation6 + $0x308] ss:$24 sps:$4 sm:$0xff]  }
 0x24a   :  { %4259 = vmatprep.subr.bf16.mxu0 %v6308_v8  ;;  %v6371_v8 = vld [vmem:[#allocation6 + $0x5dc] ss:$24 sps:$4 sm:$0xff]  }
 0x24c   :  { %v2249_v49 = vpop.f32.mrf.mxu0 }
 0x24d   :  { %v2250_v48 = vadd.f32 %v2249_v49, %v2209_v47  ;;  %4260 = vmatpush2.bf16.msra.mxu0 %v6306_v45  ;;  %v6369_v45 = vld [vmem:[#allocation6 + $0x5d8] ss:$24 sps:$4 sm:$0xff]   ;;  %v6380_v49 = vld [vmem:[#allocation6 + $0x5b4] ss:$24 sps:$4 sm:$0xff]  }
 0x24e   :  { %v2251_v53 = vpop.f32.mrf.mxu0  ;;  %4261 = vmatprep.subr.bf16.mxu0 %v6314_v46  ;;  %v6377_v46 = vld [vmem:[#allocation6 + $0x5ac] ss:$24 sps:$4 sm:$0xff]   ;;  %v6372_v47 = vld [vmem:[#allocation6 + $0x5e0] ss:$24 sps:$4 sm:$0xff]  }
 0x24f   :  { %v2252_v33 = vadd.f32 %v2251_v53, %v2211_v50  ;;  %v2260_v57 = vmax.f32 %v2250_v48, 0.0  ;;  %v6375_v50 = vld [vmem:[#allocation6 + $0x5a8] ss:$24 sps:$4 sm:$0xff]   ;;  %v6383_v48 = vld [vmem:[#allocation6 + $0x57c] ss:$24 sps:$4 sm:$0xff]  }
 0x250   :  { %v2253_v13 = vpop.f32.mrf.mxu0  ;;  %v6386_v53 = vld [vmem:[#allocation6 + $0x584] ss:$24 sps:$4 sm:$0xff]  }
 0x251   :  { %v2261_v58 = vmax.f32 %v2252_v33, 0.0  ;;  %4262 = vmatpush2.bf16.msra.mxu0 %v6312_v27  ;;  %v6880_v1 = vpack.c.bf16 %v2260_v57, %v2260_v57  ;;  %v6378_v27 = vld [vmem:[#allocation6 + $0x5b0] ss:$24 sps:$4 sm:$0xff]   ;;  %v6389_v33 = vld [vmem:[#allocation6 + $0x54c] ss:$24 sps:$4 sm:$0xff]  }
 0x252   :  { %v2254_v62 = vpop.f32.mrf.mxu0  ;;  %4263 = vmatprep.subr.bf16.mxu0 %v6320_v55  ;;  %v6381_v55 = vld [vmem:[#allocation6 + $0x578] ss:$24 sps:$4 sm:$0xff]   ;;  %v6392_v13 = vld [vmem:[#allocation6 + $0x554] ss:$24 sps:$4 sm:$0xff]  }
 0x253   :  { %v6878_v63 = vpack.c.bf16 %v2261_v58, %v2261_v58  ;;  %v6384_v57 = vld [vmem:[#allocation6 + $0x580] ss:$24 sps:$4 sm:$0xff]   ;;  %v6390_v62 = vld [vmem:[#allocation6 + $0x550] ss:$24 sps:$4 sm:$0xff]  }
 0x254   :  { %v6387_v58 = vld [vmem:[#allocation6 + $0x548] ss:$24 sps:$4 sm:$0xff]  }
 0x255   :  { %4264 = vmatpush2.bf16.msra.mxu0 %v6318_v59  ;;  %4142 = vmatprep.mubr.bf16.mxu1 %v6878_v63  ;;  %v6395_v59 = vld [vmem:[#allocation6 + $0x51c] ss:$24 sps:$4 sm:$0xff]  }
 0x256   :  { %4265 = vmatprep.mubr.bf16.mxu0 %v6878_v63  ;;  %v6884_v3 = vpop.f32.mrf.mxu1  ;;  %4143 = vmatmul.mubr.bf16.vlgmr.msra.gmra.mxu1 %v6880_v1 }
 0x257   :  { %4193 = vmatpush1.bf16.msra.mxu1 %v6321_v61  ;;  %4224 = vmatprep.mubr.bf16.mxu1 %v6850_v21  ;;  %v6398_v61 = vld [vmem:[#allocation6 + $0x524] ss:$24 sps:$4 sm:$0xff]  }
 0x258   :  { %4266 = vmatmul.mubr.bf16.vlgmr.msra.gmra.mxu0 %v6880_v1  ;;  %4315 = vmatprep.subr.bf16.mxu0 %v6326_v0  ;;  %v6889_v9 = vpop.f32.mrf.mxu1  ;;  %v6393_v0 = vld [vmem:[#allocation6 + $0x518] ss:$24 sps:$4 sm:$0xff]  }
 0x259   :  { %4316 = vmatpush1.bf16.msra.mxu0 %v6324_v2  ;;  %4347 = vmatprep.mubr.bf16.mxu0 %v6850_v21  ;;  %v6342_v21 = vld [vmem:[#allocation6 + $0x3d0] ss:$24 sps:$4 sm:$0xff]   ;;  %v6401_v2 = vld [vmem:[#allocation6 + $0x4ec] ss:$24 sps:$4 sm:$0xff]  }
 0x25a   :  { %4194 = vmatprep.subr.bf16.mxu1 %v6329_v4  ;;  %v4066_v12 = vpop.f32.mrf.mxu1  ;;  %4317 = vmatprep.subr.bf16.mxu0 %v6332_v6  ;;  %v6396_v4 = vld [vmem:[#allocation6 + $0x520] ss:$24 sps:$4 sm:$0xff]   ;;  %v6404_v6 = vld [vmem:[#allocation6 + $0x4f4] ss:$24 sps:$4 sm:$0xff]  }
 0x25b   :  { %4195 = vmatpush1.bf16.msra.mxu1 %v6327_v7  ;;  %v6399_v7 = vld [vmem:[#allocation6 + $0x4e8] ss:$24 sps:$4 sm:$0xff]   ;;  %v6410_v12 = vld [vmem:[#allocation6 + $0x4c4] ss:$24 sps:$4 sm:$0xff]  }
 0x25c   :  { %v4067_v15 = vpop.f32.mrf.mxu1  ;;  %4196 = vmatprep.subr.bf16.mxu1 %v6335_v10  ;;  %v6407_v10 = vld [vmem:[#allocation6 + $0x4bc] ss:$24 sps:$4 sm:$0xff]  }
 0x25d   :  { %4318 = vmatpush1.bf16.msra.mxu0 %v6330_v11  ;;  %v6402_v11 = vld [vmem:[#allocation6 + $0x4f0] ss:$24 sps:$4 sm:$0xff]   ;;  %v6408_v15 = vld [vmem:[#allocation6 + $0x4c0] ss:$24 sps:$4 sm:$0xff]  }
 0x25e   :  { %4319 = vmatprep.subr.bf16.mxu0 %v6338_v51  ;;  %v6405_v51 = vld [vmem:[#allocation6 + $0x4b8] ss:$24 sps:$4 sm:$0xff]  }
 0x25f   :  { %4197 = vmatpush1.bf16.msra.mxu1 %v6333_v14  ;;  %v6413_v14 = vld [vmem:[#allocation6 + $0x48c] ss:$24 sps:$4 sm:$0xff]  }
 0x260   :  { %4198 = vmatprep.subr.bf16.mxu1 %v6341_v16  ;;  %v6416_v16 = vld [vmem:[#allocation6 + $0x494] ss:$24 sps:$4 sm:$0xff]  }
 0x261   :  { %4320 = vmatpush1.bf16.msra.mxu0 %v6336_v17  ;;  %v6411_v17 = vld [vmem:[#allocation6 + $0x488] ss:$24 sps:$4 sm:$0xff]  }
 0x262   :  { %4321 = vmatprep.subr.bf16.mxu0 %v6344_v18  ;;  %v6892_v18 = vld [vmem:[#allocation7] sm:$0x3f] }
 0x263   :  { %4199 = vmatpush1.bf16.msra.mxu1 %v6339_v56  ;;  %v6419_v56 = vld [vmem:[#allocation6 + $0x164] ss:$24 sps:$4 sm:$0xff]  }
 0x264   :  { %4200 = vmatprep.subr.bf16.mxu1 %v6347_v19  ;;  %v6414_v19 = vld [vmem:[#allocation6 + $0x490] ss:$24 sps:$4 sm:$0xff]  }
 0x265   :  { %4322 = vmatpush1.bf16.msra.mxu0 %v6342_v21  ;;  %v6498_v21 = vld [vmem:[#allocation9 + $0x78] sm:$0xff]  }
 0x266   :  { %4323 = vmatprep.subr.bf16.mxu0 %v6350_v20  ;;  %v2561_v20 = vrot.slane %v6892_v18, %v398_v29  ;;  %v6420_v29 = vld [vmem:[#allocation6 + $0x130] ss:$24 sps:$4 sm:$0xff]  }
 0x267   :  { %4201 = vmatpush1.bf16.msra.mxu1 %v6345_v22  ;;  %v6417_v22 = vld [vmem:[#allocation6 + $0x160] ss:$24 sps:$4 sm:$0xff]  }
 0x268   :  { %4202 = vmatprep.subr.bf16.mxu1 %v6353_v25  ;;  %v6422_v25 = vld [vmem:[#allocation6 + $0x134] ss:$24 sps:$4 sm:$0xff]  }
 0x269   :  { %4324 = vmatpush1.bf16.msra.mxu0 %v6348_v26  ;;  %v2565_v26 = vrot.slane %v6892_v18, %v402_v32 }
 0x26a   :  { %4325 = vmatprep.subr.bf16.mxu0 %v6356_v28  ;;  %v6502_v28 = vld [vmem:[#allocation9 + $0x38] sm:$0xff]  }
 0x26b   :  { %4203 = vmatpush1.bf16.msra.mxu1 %v6351_v31  ;;  %v6503_v31 = vld [vmem:[#allocation9 + $0x70] sm:$0xff]  }
 0x26c   :  { %4204 = vmatprep.subr.bf16.mxu1 %v6359_v35  ;;  %v4063_v35 = vadd.f32 %v6884_v3, %v2561_v20  ;;  %v6423_v3 = vld [vmem:[#allocation6 + $0x100] ss:$24 sps:$4 sm:$0xff]   ;;  %v6462_v20 = vld [vmem:[#allocation6 + $0x190] ss:$24 sps:$4 sm:$0xff]  }
 0x26d   :  { %4326 = vmatpush1.bf16.msra.mxu0 %v6354_v36 }
 0x26e   :  { %4327 = vmatprep.subr.bf16.mxu0 %v6362_v52  ;;  %v6425_v52 = vld [vmem:[#allocation6 + $0x104] ss:$24 sps:$4 sm:$0xff]  }
 0x26f   :  { %4205 = vmatpush1.bf16.msra.mxu1 %v6357_v39  ;;  %v4065_v39 = vadd.f32 %v6889_v9, %v2565_v26  ;;  %v6426_v9 = vld [vmem:[#allocation6 + $0xd0] ss:$24 sps:$4 sm:$0xff]   ;;  %v6470_v26 = vld [vmem:[#allocation6 + $0x734] ss:$24 sps:$4 sm:$0xff]  }
 0x270   :  { %4206 = vmatprep.subr.bf16.mxu1 %v6365_v34  ;;  %v6507_v34 = vld [vmem:[#allocation9 + $0x30] sm:$0xff]  }
 0x271   :  { %4328 = vmatpush1.bf16.msra.mxu0 %v6360_v40 }
 0x272   :  { %4329 = vmatprep.subr.bf16.mxu0 %v6368_v41  ;;  %v6508_v41 = vld [vmem:[#allocation9 + $0x68] sm:$0xff]  }
 0x273   :  { %4207 = vmatpush1.bf16.msra.mxu1 %v6363_v42 }
 0x274   :  { %4208 = vmatprep.subr.bf16.mxu1 %v6371_v8  ;;  %v6428_v8 = vld [vmem:[#allocation6 + $0xd4] ss:$24 sps:$4 sm:$0xff]  }
 0x275   :  { %4330 = vmatpush1.bf16.msra.mxu0 %v6366_v43 }
 0x276   :  { %4331 = vmatprep.subr.bf16.mxu0 %v6374_v44  ;;  %v6513_v44 = vld [vmem:[#allocation9 + $0x60] sm:$0xff]  }
 0x277   :  { %4209 = vmatpush2.bf16.msra.mxu1 %v6369_v45  ;;  %v6431_v45 = vld [vmem:[#allocation6 + $0xa4] ss:$24 sps:$4 sm:$0xff]  }
 0x278   :  { %4210 = vmatprep.subr.bf16.mxu1 %v6377_v46  ;;  %v6517_v46 = vld [vmem:[#allocation9 + $0x20] sm:$0xff]  }
 0x279   :  { %4332 = vmatpush2.bf16.msra.mxu0 %v6372_v47  ;;  %v6518_v47 = vld [vmem:[#allocation9 + $0x58] sm:$0xff]  }
 0x27a   :  { %4333 = vmatprep.subr.bf16.mxu0 %v6380_v49  ;;  %v6429_v49 = vld [vmem:[#allocation6 + $0xa0] ss:$24 sps:$4 sm:$0xff]  }
 0x27b   :  { %4211 = vmatpush2.bf16.msra.mxu1 %v6375_v50  ;;  %v6434_v50 = vld [vmem:[#allocation6 + $0x74] ss:$24 sps:$4 sm:$0xff]  }
 0x27c   :  { %4212 = vmatprep.subr.bf16.mxu1 %v6383_v48  ;;  %v6522_v48 = vld [vmem:[#allocation9 + $0x18] sm:$0xff]  }
 0x27d   :  { %4334 = vmatpush2.bf16.msra.mxu0 %v6378_v27  ;;  %v6523_v27 = vld [vmem:[#allocation9 + $0x50] sm:$0xff]  }
 0x27e   :  { %4335 = vmatprep.subr.bf16.mxu0 %v6386_v53  ;;  %v6432_v53 = vld [vmem:[#allocation6 + $0x70] ss:$24 sps:$4 sm:$0xff]  }
 0x27f   :  { %4213 = vmatpush2.bf16.msra.mxu1 %v6381_v55  ;;  %v6437_v55 = vld [vmem:[#allocation6 + $0x44] ss:$24 sps:$4 sm:$0xff]  }
 0x280   :  { %4214 = vmatprep.subr.bf16.mxu1 %v6389_v33  ;;  %v6524_v33 = vld [vmem:[#allocation9 + $0x10] sm:$0xff]  }
 0x281   :  { %4336 = vmatpush2.bf16.msra.mxu0 %v6384_v57  ;;  %v6525_v57 = vld [vmem:[#allocation9 + $0x48] sm:$0xff]  }
 0x282   :  { %4337 = vmatprep.subr.bf16.mxu0 %v6392_v13  ;;  %v6435_v13 = vld [vmem:[#allocation6 + $0x40] ss:$24 sps:$4 sm:$0xff]  }
 0x283   :  { %4215 = vmatpush2.bf16.msra.mxu1 %v6387_v58  ;;  %v6440_v58 = vld [vmem:[#allocation6 + $0x14] ss:$24 sps:$4 sm:$0xff]  }
 0x284   :  { %4216 = vmatprep.subr.bf16.mxu1 %v6395_v59  ;;  %v6526_v59 = vld [vmem:[#allocation9 + $0x8] sm:$0xff]  }
 0x285   :  { %4338 = vmatpush2.bf16.msra.mxu0 %v6390_v62  ;;  %v6527_v62 = vld [vmem:[#allocation9 + $0x40] sm:$0xff]  }
 0x286   :  { %4339 = vmatprep.subr.bf16.mxu0 %v6398_v61  ;;  %v6438_v61 = vld [vmem:[#allocation6 + $0x10] ss:$24 sps:$4 sm:$0xff]  }
 0x287   :  { %4217 = vmatpush2.bf16.msra.mxu1 %v6393_v0  ;;  %v6443_v0 = vld [vmem:[#allocation6 + $0x2e4] ss:$24 sps:$4 sm:$0xff]  }
 0x288   :  { %4218 = vmatprep.subr.bf16.mxu1 %v6401_v2  ;;  %v6528_v2 = vld [vmem:[#allocation9] sm:$0xff]  }
 0x289   :  { %4340 = vmatpush2.bf16.msra.mxu0 %v6396_v4  ;;  %v6441_v4 = vld [vmem:[#allocation6 + $0x2e0] ss:$24 sps:$4 sm:$0xff]  }
 0x28a   :  { %4341 = vmatprep.subr.bf16.mxu0 %v6404_v6  ;;  %v6446_v6 = vld [vmem:[#allocation6 + $0x2b4] ss:$24 sps:$4 sm:$0xff]  }
 0x28b   :  { %4219 = vmatpush2.bf16.msra.mxu1 %v6399_v7  ;;  %v6444_v7 = vld [vmem:[#allocation6 + $0x2b0] ss:$24 sps:$4 sm:$0xff]  }
 0x28c   :  { %4220 = vmatprep.subr.bf16.mxu1 %v6407_v10  ;;  %v6449_v10 = vld [vmem:[#allocation6 + $0x284] ss:$24 sps:$4 sm:$0xff]  }
 0x28d   :  { %4342 = vmatpush2.bf16.msra.mxu0 %v6402_v11  ;;  %v6447_v11 = vld [vmem:[#allocation6 + $0x280] ss:$24 sps:$4 sm:$0xff]  }
 0x28e   :  { %4343 = vmatprep.subr.bf16.mxu0 %v6410_v12  ;;  %v6452_v12 = vld [vmem:[#allocation6 + $0x254] ss:$24 sps:$4 sm:$0xff]  }
 0x28f   :  { %4221 = vmatpush2.bf16.msra.mxu1 %v6405_v51  ;;  %v6450_v51 = vld [vmem:[#allocation6 + $0x250] ss:$24 sps:$4 sm:$0xff]  }
 0x290   :  { %4222 = vmatprep.subr.bf16.mxu1 %v6413_v14  ;;  %v6455_v14 = vld [vmem:[#allocation6 + $0x224] ss:$24 sps:$4 sm:$0xff]  }
 0x291   :  { %4344 = vmatpush2.bf16.msra.mxu0 %v6408_v15  ;;  %v6453_v15 = vld [vmem:[#allocation6 + $0x220] ss:$24 sps:$4 sm:$0xff]  }
 0x292   :  { %4345 = vmatprep.subr.bf16.mxu0 %v6416_v16  ;;  %v6458_v16 = vld [vmem:[#allocation6 + $0x1f4] ss:$24 sps:$4 sm:$0xff]  }
 0x293   :  { %4223 = vmatpush2.bf16.msra.mxu1 %v6411_v17  ;;  %v6456_v17 = vld [vmem:[#allocation6 + $0x1f0] ss:$24 sps:$4 sm:$0xff]  }
 0x294   :  { %4274 = vmatprep.subr.bf16.mxu1 %v6419_v56  ;;  %v6461_v56 = vld [vmem:[#allocation6 + $0x1c4] ss:$24 sps:$4 sm:$0xff]  }
 0x295   :  { %4346 = vmatpush2.bf16.msra.mxu0 %v6414_v19  ;;  %v6459_v19 = vld [vmem:[#allocation6 + $0x1c0] ss:$24 sps:$4 sm:$0xff]  }
 0x296   :  { %4225 = vmatmul.mubr.bf16.vlgmr.msra.gmra.mxu1 %v6852_v24  ;;  %5567 = vmatprep.subr.bf16.mxu0 %v6498_v21  ;;  %v6464_v21 = vld [vmem:[#allocation6 + $0x194] ss:$24 sps:$4 sm:$0xff]  }
 0x297   :  { %4275 = vmatpush1.bf16.msra.mxu1 %v6417_v22  ;;  %4306 = vmatprep.mubr.bf16.mxu1 %v6834_v37  ;;  %v6467_v22 = vld [vmem:[#allocation6 + $0x764] ss:$24 sps:$4 sm:$0xff]  }
 0x298   :  { %4348 = vmatmul.mubr.bf16.vlgmr.msra.gmra.mxu0 %v6852_v24  ;;  %v4103_v36 = vpop.f32.mrf.mxu0  ;;  %4276 = vmatprep.subr.bf16.mxu1 %v6422_v25  ;;  %v6512_v24 = vld [vmem:[#allocation9 + $0x28] sm:$0xff]   ;;  %v6465_v25 = vld [vmem:[#allocation6 + $0x760] ss:$24 sps:$4 sm:$0xff]  }
 0x299   :  { %v6905_v32 = vadd.f32 %v4103_v36, %v4063_v35  ;;  %5568 = vmatpush3.bf16.msra.mxu0 %v6502_v28  ;;  %v6468_v28 = vld [vmem:[#allocation6 + $0x730] ss:$24 sps:$4 sm:$0xff]   ;;  %v6473_v35 = vld [vmem:[#allocation6 + $0x704] ss:$24 sps:$4 sm:$0xff]   ;;  %v6471_v36 = vld [vmem:[#allocation6 + $0x700] ss:$24 sps:$4 sm:$0xff]  }
 0x29a   :  { %v4105_v40 = vpop.f32.mrf.mxu0  ;;  %5569 = vmatprep.subr.bf16.mxu0 %v6503_v31 }
 0x29b   :  { %v6907_v42 = vadd.f32 %v4105_v40, %v4065_v39  ;;  %4277 = vmatpush1.bf16.msra.mxu1 %v6420_v29  ;;  %v6476_v39 = vld [vmem:[#allocation6 + $0x6d4] ss:$24 sps:$4 sm:$0xff]   ;;  %v6474_v40 = vld [vmem:[#allocation6 + $0x6d0] ss:$24 sps:$4 sm:$0xff]  }
 0x29c   :  { %v4107_v37 = vpop.f32.mrf.mxu0  ;;  %4278 = vmatprep.subr.bf16.mxu1 %v6425_v52 }
 0x29d   :  { %5570 = vmatpush3.bf16.msra.mxu0 %v6507_v34  ;;  %v6485_v37 = vld [vmem:[#allocation6 + $0x644] ss:$24 sps:$4 sm:$0xff]  }
 0x29e   :  { %v4108_v43 = vpop.f32.mrf.mxu0  ;;  %5571 = vmatprep.subr.bf16.mxu0 %v6508_v41  ;;  %v6477_v41 = vld [vmem:[#allocation6 + $0x6a0] ss:$24 sps:$4 sm:$0xff]  }
 0x29f   :  { %4279 = vmatpush1.bf16.msra.mxu1 %v6423_v3  ;;  %v6480_v3 = vld [vmem:[#allocation6 + $0x670] ss:$24 sps:$4 sm:$0xff]  }
 0x2a0   :  { %4280 = vmatprep.subr.bf16.mxu1 %v6428_v8  ;;  %v6483_v8 = vld [vmem:[#allocation6 + $0x640] ss:$24 sps:$4 sm:$0xff]   ;;  %v6486_v43 = vld [vmem:[#allocation6 + $0x610] ss:$24 sps:$4 sm:$0xff]  }
 0x2a1   :  { %5572 = vmatpush3.bf16.msra.mxu0 %v6512_v24  ;;  %v6488_v24 = vld [vmem:[#allocation6 + $0x614] ss:$24 sps:$4 sm:$0xff]  }
 0x2a2   :  { %5573 = vmatprep.subr.bf16.mxu0 %v6513_v44  ;;  %v6491_v44 = vld [vmem:[#allocation6 + $0x8e4] ss:$24 sps:$4 sm:$0xff]  }
 0x2a3   :  { %4281 = vmatpush1.bf16.msra.mxu1 %v6426_v9  ;;  %v6489_v9 = vld [vmem:[#allocation6 + $0x8e0] ss:$24 sps:$4 sm:$0xff]  }
 0x2a4   :  { %4282 = vmatprep.subr.bf16.mxu1 %v6431_v45  ;;  %v6494_v45 = vld [vmem:[#allocation6 + $0x8b4] ss:$24 sps:$4 sm:$0xff]  }
 0x2a5   :  { %5574 = vmatpush3.bf16.msra.mxu0 %v6517_v46  ;;  %v6492_v46 = vld [vmem:[#allocation6 + $0x8b0] ss:$24 sps:$4 sm:$0xff]  }
 0x2a6   :  { %5575 = vmatprep.subr.bf16.mxu0 %v6518_v47  ;;  %v6497_v47 = vld [vmem:[#allocation6 + $0x884] ss:$24 sps:$4 sm:$0xff]  }
 0x2a7   :  { %4283 = vmatpush1.bf16.msra.mxu1 %v6429_v49  ;;  %v6495_v49 = vld [vmem:[#allocation6 + $0x880] ss:$24 sps:$4 sm:$0xff]  }
 0x2a8   :  { %4284 = vmatprep.subr.bf16.mxu1 %v6434_v50  ;;  %v6501_v50 = vld [vmem:[#allocation6 + $0x854] ss:$24 sps:$4 sm:$0xff]  }
 0x2a9   :  { %5576 = vmatpush3.bf16.msra.mxu0 %v6522_v48  ;;  %v6499_v48 = vld [vmem:[#allocation6 + $0x850] ss:$24 sps:$4 sm:$0xff]  }
 0x2aa   :  { %5577 = vmatprep.subr.bf16.mxu0 %v6523_v27  ;;  %v6506_v27 = vld [vmem:[#allocation6 + $0x824] ss:$24 sps:$4 sm:$0xff]  }
 0x2ab   :  { %4285 = vmatpush1.bf16.msra.mxu1 %v6432_v53  ;;  %v6504_v53 = vld [vmem:[#allocation6 + $0x820] ss:$24 sps:$4 sm:$0xff]  }
 0x2ac   :  { %4286 = vmatprep.subr.bf16.mxu1 %v6437_v55  ;;  %v6511_v55 = vld [vmem:[#allocation6 + $0x7f4] ss:$24 sps:$4 sm:$0xff]  }
 0x2ad   :  { %5578 = vmatpush3.bf16.msra.mxu0 %v6524_v33  ;;  %v6509_v33 = vld [vmem:[#allocation6 + $0x7f0] ss:$24 sps:$4 sm:$0xff]  }
 0x2ae   :  { %5579 = vmatprep.subr.bf16.mxu0 %v6525_v57  ;;  %v6516_v57 = vld [vmem:[#allocation6 + $0x7c4] ss:$24 sps:$4 sm:$0xff]  }
 0x2af   :  { %4287 = vmatpush1.bf16.msra.mxu1 %v6435_v13  ;;  %v6514_v13 = vld [vmem:[#allocation6 + $0x7c0] ss:$24 sps:$4 sm:$0xff]  }
 0x2b0   :  { %4288 = vmatprep.subr.bf16.mxu1 %v6440_v58  ;;  %v6521_v58 = vld [vmem:[#allocation6 + $0x794] ss:$24 sps:$4 sm:$0xff]  }
 0x2b1   :  { %5580 = vmatpush3.bf16.msra.mxu0 %v6526_v59  ;;  %v6519_v59 = vld [vmem:[#allocation6 + $0x790] ss:$24 sps:$4 sm:$0xff]  }
 0x2b2   :  { %5581 = vmatprep.subr.bf16.mxu0 %v6527_v62  ;;  %v6529_v62 = vld [vmem:[#allocation9 + $0xf8] sm:$0xff]  }
 0x2b3   :  { %4289 = vmatpush1.bf16.msra.mxu1 %v6438_v61  ;;  %v6530_v61 = vld [vmem:[#allocation9 + $0xb8] sm:$0xff]  }
 0x2b4   :  { %4290 = vmatprep.subr.bf16.mxu1 %v6443_v0  ;;  %v6531_v0 = vld [vmem:[#allocation9 + $0xf0] sm:$0xff]  }
 0x2b5   :  { %5582 = vmatpush3.bf16.msra.mxu0 %v6528_v2 }
 0x2b7   :  { %4291 = vmatpush2.bf16.msra.mxu1 %v6441_v4 }
 0x2b8   :  { %4292 = vmatprep.subr.bf16.mxu1 %v6446_v6  ;;  %v6532_v6 = vld [vmem:[#allocation9 + $0xb0] sm:$0xff]  }
 0x2bb   :  { %4293 = vmatpush2.bf16.msra.mxu1 %v6444_v7 }
 0x2bc   :  { %4294 = vmatprep.subr.bf16.mxu1 %v6449_v10 }
 0x2bf   :  { %4295 = vmatpush2.bf16.msra.mxu1 %v6447_v11  ;;  %v6533_v11 = vld [vmem:[#allocation9 + $0xe8] sm:$0xff]  }
 0x2c0   :  { %4296 = vmatprep.subr.bf16.mxu1 %v6452_v12 }
 0x2c3   :  { %4297 = vmatpush2.bf16.msra.mxu1 %v6450_v51 }
 0x2c4   :  { %4298 = vmatprep.subr.bf16.mxu1 %v6455_v14 }
 0x2c7   :  { %4299 = vmatpush2.bf16.msra.mxu1 %v6453_v15 }
 0x2c8   :  { %4300 = vmatprep.subr.bf16.mxu1 %v6458_v16 }
 0x2cb   :  { %4301 = vmatpush2.bf16.msra.mxu1 %v6456_v17  ;;  %v6534_v17 = vld [vmem:[#allocation9 + $0xa8] sm:$0xff]  }
 0x2cc   :  { %4302 = vmatprep.subr.bf16.mxu1 %v6461_v56 }
 0x2cf   :  { %4303 = vmatpush2.bf16.msra.mxu1 %v6459_v19  ;;  %v6545_v19 = vld [vmem:[#allocation9 + $0x178] sm:$0xff]  }
 0x2d0   :  { %4304 = vmatprep.subr.bf16.mxu1 %v6464_v21  ;;  %5611 = vmatprep.subr.bf16.mxu0 %v6545_v19 }
 0x2d3   :  { %4305 = vmatpush2.bf16.msra.mxu1 %v6462_v20  ;;  %v6546_v20 = vld [vmem:[#allocation9 + $0x138] sm:$0xff]  }
 0x2d4   :  { %4356 = vmatprep.subr.bf16.mxu1 %v6467_v22 }
 0x2d6   :  { %4307 = vmatmul.mubr.bf16.vlgmr.msra.gmra.mxu1 %v6836_v60  ;;  %v6479_v60 = vld [vmem:[#allocation6 + $0x6a4] ss:$24 sps:$4 sm:$0xff]  }
 0x2d7   :  { %4357 = vmatpush1.bf16.msra.mxu1 %v6465_v25  ;;  %4388 = vmatprep.mubr.bf16.mxu1 %v6878_v63  ;;  %v6482_v63 = vld [vmem:[#allocation6 + $0x674] ss:$24 sps:$4 sm:$0xff]  }
 0x2d8   :  { %v6911_v31 = vpop.f32.mrf.mxu0  ;;  %4358 = vmatprep.subr.bf16.mxu1 %v6470_v26  ;;  %v6547_v26 = vld [vmem:[#allocation9 + $0x170] sm:$0xff]  }
 0x2da   :  { %v6913_v29 = vpop.f32.mrf.mxu0 }
 0x2db   :  { %4359 = vmatpush1.bf16.msra.mxu1 %v6468_v28  ;;  %v6537_v28 = vld [vmem:[#allocation9 + $0xd8] sm:$0xff]  }
 0x2dc   :  { %v4189_v52 = vpop.f32.mrf.mxu0  ;;  %4360 = vmatprep.subr.bf16.mxu1 %v6473_v35  ;;  %v6548_v35 = vld [vmem:[#allocation9 + $0x130] sm:$0xff]  }
 0x2dd   :  { %v6538_v52 = vld [vmem:[#allocation9 + $0x98] sm:$0xff]  }
 0x2de   :  { %v4190_v34 = vpop.f32.mrf.mxu0 }
 0x2df   :  { %4361 = vmatpush1.bf16.msra.mxu1 %v6471_v36  ;;  %v6549_v36 = vld [vmem:[#allocation9 + $0x168] sm:$0xff]  }
 0x2e0   :  { %4362 = vmatprep.subr.bf16.mxu1 %v6476_v39  ;;  %v6539_v39 = vld [vmem:[#allocation9 + $0xd0] sm:$0xff]   ;;  %v6550_v34 = vld [vmem:[#allocation9 + $0x128] sm:$0xff]  }
 0x2e3   :  { %4363 = vmatpush1.bf16.msra.mxu1 %v6474_v40  ;;  %v6551_v40 = vld [vmem:[#allocation9 + $0x160] sm:$0xff]  }
 0x2e4   :  { %4364 = vmatprep.subr.bf16.mxu1 %v6479_v60  ;;  %v6540_v60 = vld [vmem:[#allocation9 + $0x90] sm:$0xff]  }
 0x2e7   :  { %4365 = vmatpush1.bf16.msra.mxu1 %v6477_v41  ;;  %v6541_v41 = vld [vmem:[#allocation9 + $0xc8] sm:$0xff]  }
 0x2e8   :  { %4366 = vmatprep.subr.bf16.mxu1 %v6482_v63  ;;  %v6552_v63 = vld [vmem:[#allocation9 + $0x120] sm:$0xff]  }
 0x2eb   :  { %4367 = vmatpush1.bf16.msra.mxu1 %v6480_v3  ;;  %v6553_v3 = vld [vmem:[#allocation9 + $0x158] sm:$0xff]  }
 0x2ec   :  { %4368 = vmatprep.subr.bf16.mxu1 %v6485_v37  ;;  %v6542_v37 = vld [vmem:[#allocation9 + $0x88] sm:$0xff]  }
 0x2ef   :  { %4369 = vmatpush1.bf16.msra.mxu1 %v6483_v8  ;;  %v6543_v8 = vld [vmem:[#allocation9 + $0xc0] sm:$0xff]  }
 0x2f0   :  { %4370 = vmatprep.subr.bf16.mxu1 %v6488_v24  ;;  %v6554_v24 = vld [vmem:[#allocation9 + $0x118] sm:$0xff]  }
 0x2f3   :  { %4371 = vmatpush1.bf16.msra.mxu1 %v6486_v43  ;;  %v6555_v43 = vld [vmem:[#allocation9 + $0x150] sm:$0xff]  }
 0x2f4   :  { %4372 = vmatprep.subr.bf16.mxu1 %v6491_v44  ;;  %v6544_v44 = vld [vmem:[#allocation9 + $0x80] sm:$0xff]  }
 0x2f7   :  { %4373 = vmatpush2.bf16.msra.mxu1 %v6489_v9  ;;  %v6556_v9 = vld [vmem:[#allocation9 + $0x110] sm:$0xff]  }
 0x2f8   :  { %4374 = vmatprep.subr.bf16.mxu1 %v6494_v45  ;;  %v2569_v45 = vrot.slane %v6892_v18, %v406_v30 }
 0x2fb   :  { %4375 = vmatpush2.bf16.msra.mxu1 %v6492_v46  ;;  %v2573_v46 = vrot.slane %v6892_v18, %v410_v54 }
 0x2fc   :  { %4376 = vmatprep.subr.bf16.mxu1 %v6497_v47  ;;  %v4186_v47 = vadd.f32 %v6911_v31, %v2569_v45 }
 0x2ff   :  { %4377 = vmatpush2.bf16.msra.mxu1 %v6495_v49 }
 0x300   :  { %4378 = vmatprep.subr.bf16.mxu1 %v6501_v50  ;;  %v6557_v50 = vld [vmem:[#allocation9 + $0x148] sm:$0xff]  }
 0x303   :  { %4379 = vmatpush2.bf16.msra.mxu1 %v6499_v48  ;;  %v4188_v48 = vadd.f32 %v6913_v29, %v2573_v46 }
 0x304   :  { %4380 = vmatprep.subr.bf16.mxu1 %v6506_v27 }
 0x307   :  { %4381 = vmatpush2.bf16.msra.mxu1 %v6504_v53  ;;  %v6558_v53 = vld [vmem:[#allocation9 + $0x108] sm:$0xff]  }
 0x308   :  { %4382 = vmatprep.subr.bf16.mxu1 %v6511_v55 }
 0x30b   :  { %4383 = vmatpush2.bf16.msra.mxu1 %v6509_v33 }
 0x30c   :  { %4384 = vmatprep.subr.bf16.mxu1 %v6516_v57 }
 0x30f   :  { %4385 = vmatpush2.bf16.msra.mxu1 %v6514_v13 }
 0x310   :  { %4386 = vmatprep.subr.bf16.mxu1 %v6521_v58 }
 0x313   :  { %4387 = vmatpush2.bf16.msra.mxu1 %v6519_v59  ;;  %v6559_v59 = vld [vmem:[#allocation9 + $0x140] sm:$0xff]  }
 0x314   :  { %5589 = vmatprep.subr.bf16.mxu1 %v6529_v62  ;;  %v6560_v62 = vld [vmem:[#allocation9 + $0x100] sm:$0xff]  }
 0x316   :  { %4389 = vmatmul.mubr.bf16.vlgmr.msra.gmra.mxu1 %v6880_v1  ;;  %v4144_v2 = vpop.f32.mrf.mxu1 }
 0x317   :  { %v4145_v4 = vadd.f32 %v4144_v2, %v6905_v32  ;;  %5590 = vmatpush3.bf16.msra.mxu1 %v6530_v61  ;;  %v6535_v32 = vld [vmem:[#allocation9 + $0xe0] sm:$0xff]  }
 0x318   :  { %v6917_v7 = vpop.f32.mrf.mxu0  ;;  %v4146_v10 = vpop.f32.mrf.mxu1  ;;  %5591 = vmatprep.subr.bf16.mxu1 %v6531_v0 }
 0x319   :  { %v4147_v12 = vadd.f32 %v4146_v10, %v6907_v42  ;;  %v4397_v51 = vmax.f32 %v4145_v4, 0.0  ;;  %v6536_v42 = vld [vmem:[#allocation9 + $0xa0] sm:$0xff]  }
 0x31a   :  { %v6920_v14 = vpop.f32.mrf.mxu0  ;;  %v4148_v15 = vpop.f32.mrf.mxu1 }
 0x31b   :  { %v4398_v16 = vmax.f32 %v4147_v12, 0.0  ;;  %5592 = vmatpush3.bf16.msra.mxu1 %v6532_v6  ;;  %v4403_v22 = vpack.c.bf16 %v4397_v51, %v4397_v51  ;;  %v2577_v51 = vrot.slane %v6892_v18, %v414_v5 }
 0x31c   :  { %v4271_v1 = vpop.f32.mrf.mxu0  ;;  %v4149_v56 = vpop.f32.mrf.mxu1  ;;  %5593 = vmatprep.subr.bf16.mxu1 %v6533_v11 }
 0x31d   :  { %v4404_v21 = vpack.c.bf16 %v4398_v16, %v4398_v16 }
 0x31e   :  { %v4272_v25 = vpop.f32.mrf.mxu0 }
 0x31f   :  { %4832 = vmatprep.mubr.bf16.mxu0 %v4404_v21  ;;  %5594 = vmatpush3.bf16.msra.mxu1 %v6534_v17 }
 0x320   :  { %4833 = vmatmul.mubr.bf16.vlgmr.msra.gmra.mxu0 %v4403_v22  ;;  %5595 = vmatprep.subr.bf16.mxu1 %v6535_v32 }
 0x321   :  { %5612 = vmatpush3.bf16.msra.mxu0 %v6546_v20 }
 0x322   :  { %5613 = vmatprep.subr.bf16.mxu0 %v6547_v26 }
 0x323   :  { %5596 = vmatpush3.bf16.msra.mxu1 %v6536_v42 }
 0x324   :  { %5597 = vmatprep.subr.bf16.mxu1 %v6537_v28 }
 0x325   :  { %5614 = vmatpush3.bf16.msra.mxu0 %v6548_v35 }
 0x326   :  { %5615 = vmatprep.subr.bf16.mxu0 %v6549_v36  ;;  %v5517_v36 = vld [vmem:[#allocation10] ss:$0 sm:$0xff] }
 0x327   :  { %5598 = vmatpush3.bf16.msra.mxu1 %v6538_v52 }
 0x328   :  { %5599 = vmatprep.subr.bf16.mxu1 %v6539_v39 }
 0x329   :  { %5616 = vmatpush3.bf16.msra.mxu0 %v6550_v34 }
 0x32a   :  { %5617 = vmatprep.subr.bf16.mxu0 %v6551_v40 }
 0x32b   :  { %5600 = vmatpush3.bf16.msra.mxu1 %v6540_v60 }
 0x32c   :  { %5601 = vmatprep.subr.bf16.mxu1 %v6541_v41 }
 0x32d   :  { %5618 = vmatpush3.bf16.msra.mxu0 %v6552_v63 }
 0x32e   :  { %5619 = vmatprep.subr.bf16.mxu0 %v6553_v3 }
 0x32f   :  { %5602 = vmatpush3.bf16.msra.mxu1 %v6542_v37 }
 0x330   :  { %5603 = vmatprep.subr.bf16.mxu1 %v6543_v8 }
 0x331   :  { %5620 = vmatpush3.bf16.msra.mxu0 %v6554_v24 }
 0x332   :  { %5621 = vmatprep.subr.bf16.mxu0 %v6555_v43 }
 0x333   :  { %5604 = vmatpush3.bf16.msra.mxu1 %v6544_v44 }
 0x335   :  { %5622 = vmatpush3.bf16.msra.mxu0 %v6556_v9 }
 0x336   :  { %5623 = vmatprep.subr.bf16.mxu0 %v6557_v50 }
 0x339   :  { %5624 = vmatpush3.bf16.msra.mxu0 %v6558_v53 }
 0x33a   :  { %5625 = vmatprep.subr.bf16.mxu0 %v6559_v59 }
 0x33d   :  { %5626 = vmatpush3.bf16.msra.mxu0 %v6560_v62 }
 0x356   :  { %v4226_v49 = vpop.f32.mrf.mxu1 }
 0x357   :  { %v4227_v27 = vadd.f32 %v4226_v49, %v4186_v47 }
 0x358   :  { %v4228_v55 = vpop.f32.mrf.mxu1  ;;  %v4349_v33 = vpop.f32.mrf.mxu0 }
 0x359   :  { %v4268_v57 = vadd.f32 %v6917_v7, %v4227_v27  ;;  %v4229_v13 = vadd.f32 %v4228_v55, %v4188_v48 }
 0x35a   :  { %v4230_v30 = vpop.f32.mrf.mxu1  ;;  %v4351_v58 = vpop.f32.mrf.mxu0 }
 0x35b   :  { %v4270_v54 = vadd.f32 %v6920_v14, %v4229_v13  ;;  %v4399_v31 = vmax.f32 %v4268_v57, 0.0  ;;  %v2581_v14 = vrot.slane %v6892_v18, %v418_v38 }
 0x35c   :  { %v4231_v61 = vpop.f32.mrf.mxu1  ;;  %v4353_v0 = vpop.f32.mrf.mxu0 }
 0x35d   :  { %v4400_v29 = vmax.f32 %v4270_v54, 0.0  ;;  %v4405_v6 = vpack.c.bf16 %v4399_v31, %v4399_v31 }
 0x35e   :  { %v4354_v2 = vpop.f32.mrf.mxu0 }
 0x35f   :  { %v4406_v4 = vpack.c.bf16 %v4400_v29, %v4400_v29 }
 0x361   :  { %4872 = vmatprep.mubr.bf16.mxu1 %v4406_v4 }
 0x362   :  { %4873 = vmatmul.mubr.bf16.vlgmr.msra.gmra.mxu1 %v4405_v6 }
 0x396   :  { %v4308_v7 = vpop.f32.mrf.mxu1 }
 0x397   :  { %v4309_v15 = vadd.f32 %v4308_v7, %v2577_v51 }
 0x398   :  { %v4310_v10 = vpop.f32.mrf.mxu1 }
 0x399   :  { %v4311_v16 = vadd.f32 %v4310_v10, %v2581_v14  ;;  %v4350_v17 = vadd.f32 %v4349_v33, %v4309_v15 }
 0x39a   :  { %v4312_v11 = vpop.f32.mrf.mxu1 }
 0x39b   :  { %v4352_v32 = vadd.f32 %v4351_v58, %v4311_v16 }
 0x39c   :  { %v4313_v12 = vpop.f32.mrf.mxu1 }
 0x3d6   :  { %v4390_v1 = vpop.f32.mrf.mxu1 }
 0x3d7   :  { %v4391_v56 = vadd.f32 %v4390_v1, %v4350_v17 }
 0x3d8   :  { %v4392_v19 = vpop.f32.mrf.mxu1 }
 0x3d9   :  { %v4393_v21 = vadd.f32 %v4392_v19, %v4352_v32  ;;  %v4401_v20 = vmax.f32 %v4391_v56, 0.0 }
 0x3da   :  { %v4394_v22 = vpop.f32.mrf.mxu1 }
 0x3db   :  { %v4402_v25 = vmax.f32 %v4393_v21, 0.0  ;;  %v4407_v28 = vpack.c.bf16 %v4401_v20, %v4401_v20 }
 0x3dc   :  { %v4395_v26 = vpop.f32.mrf.mxu1 }
 0x3dd   :  { %v4408_v42 = vpack.c.bf16 %v4402_v25, %v4402_v25 }
 0x3df   :  { %4912 = vmatprep.mubr.bf16.mxu0 %v4408_v42 }
 0x3e0   :  { %4913 = vmatmul.mubr.bf16.vlgmr.msra.gmra.mxu0 %v4407_v28  ;;  %v5583_v5 = vpop.f32.mrf.mxu0 }
 0x3e2   :  { %v5584_v23 = vpop.f32.mrf.mxu0 }
 0x3e3   :  { %v5585_v35 = vadd.f32 %v5584_v23, %v5583_v5 }
 0x3e4   :  { %v5586_v38 = vpop.f32.mrf.mxu0 }
 0x3e5   :  { %v4835_v34 = vadd.f32 %v5585_v35, %v5517_v36 }
 0x3e6   :  { %v5587_v18 = vpop.f32.mrf.mxu0 }
 0x422   :  { %v5605_v52 = vpop.f32.mrf.mxu1 }
 0x424   :  { %v5606_v39 = vpop.f32.mrf.mxu1 }
 0x425   :  { %v5607_v40 = vadd.f32 %v5606_v39, %v5605_v52 }
 0x426   :  { %v5608_v60 = vpop.f32.mrf.mxu1 }
 0x427   :  { %v4875_v41 = vadd.f32 %v5607_v40, %v4835_v34 }
 0x428   :  { %v5609_v63 = vpop.f32.mrf.mxu1 }
 0x4a0   :  { %v5627_v3 = vpop.f32.mrf.mxu0 }
 0x4a2   :  { %v5628_v37 = vpop.f32.mrf.mxu0 }
 0x4a3   :  { %v5629_v8 = vadd.f32 %v5628_v37, %v5627_v3 }
 0x4a4   :  { %v5630_v24 = vpop.f32.mrf.mxu0 }
 0x4a5   :  { %v4915_v43 = vadd.f32 %v5629_v8, %v4875_v41 }
 0x4a6   :  { %v5631_v44 = vpop.f32.mrf.mxu0 }
 0x4a7   :  { %v5566_v9 = vmul.f32 -1.442695, %v4915_v43 }
 0x4a9   :  { %6561 = vpow2.f32 %v5566_v9 }
 0x4b6   :  { %v6562_v45 = vpop.eup %6561 }
 0x4b7   :  { %v4923_v46 = vadd.f32 1.0, %v6562_v45 }
 0x4b9   :  { %6563 = vrcp.f32 %v4923_v46 }
 0x4c6   :  { %v6564_v47 = vpop.eup %6563 }
 0x4c7   :  { %4926 = vst [vmem:[%s6948_s7] sm:$0xff] %v6564_v47 }
 0x4c8   :  { %4931 = vsyncpa [#allocation3], 1 }
 0x4c9   :  { %4932 = vsyncpa [#allocation5], 1 }
 0x4ca   :  { %4933 = vsyncpa [#allocation8], 1 }
 0x4cb   :  { %4934 = vsyncpa [#allocation11], 1 }

</bundles_post_ra>
